<compile_context>
chip_gen: v5e
topology: v5e:2x2
jax: 0.10.0
libtpu: 0.0.40
codegen_flags: <defaults>
</compile_context>

<pallas_src>
import functools

import jax
import jax.numpy as jnp
from jax import lax
from jax.experimental import pallas as pl
from jax.experimental.pallas import tpu as pltpu


_NAMES = {0: "EP", 1: "IP", 2: "EN", 3: "IN"}


# -----------------------------------------------------------------------------
# Single fused kernel:
#   for each behavior b (static loop):
#       LightGCN: n_layers propagations (adj @ item, adj^T @ user) + layer mean
#   then, per entity (user / item):
#       per-feedback-type mean -> lane-dense concat -> ONE block-diag matmul
#       -> ReLU -> orthogonal denoise -> single unmasked (N, T*D) store
# -----------------------------------------------------------------------------
def _fused_kernel(n_layers, enc_idx, present, idx_lists, D,
                  adj_ref, u0_ref, i0_ref, wu_ref, wv_ref,
                  u_beh_ref, i_beh_ref, u_emb_ref, i_emb_ref):
    inv_layers = jnp.float32(1.0 / (n_layers + 1))
    K_beh = len(enc_idx)

    u_beh = []
    i_beh = []
    # K_beh and n_layers are tiny static ints -> fully unrolled, no grid
    # per-step overhead.
    for b in range(K_beh):
        adj = adj_ref[b]                      # (U, I) dense normalized adjacency
        u = u0_ref[enc_idx[b]]                # (U, D) layer-0 user emb (shared per coarse type)
        it = i0_ref[enc_idx[b]]               # (I, D) layer-0 item emb
        u_acc = u
        i_acc = it
        for _ in range(n_layers):
            # user update: aggregate items,  adj @ item   -> (U, D)
            u_new = jnp.dot(adj, it, preferred_element_type=jnp.float32)
            # item update: aggregate users,  adj^T @ user -> (I, D)
            # dim-0 contraction: no transposed copy of adj in HBM.
            i_new = lax.dot_general(adj, u, (((0,), (0,)), ((), ())),
                                    preferred_element_type=jnp.float32)
            u, it = u_new, i_new
            u_acc = u_acc + u
            i_acc = i_acc + it
        u_mean = u_acc * inv_layers           # mean over (n_layers + 1) layers
        i_mean = i_acc * inv_layers
        u_beh_ref[b] = u_mean                 # per-behavior output (returned)
        i_beh_ref[b] = i_mean
        u_beh.append(u_mean)                  # keep live — no HBM re-read
        i_beh.append(i_mean)

    def combine_denoise(beh_list, w_ref, out_ref):
        # mean over the behaviors of each present feedback type (static indices)
        parts = []
        for nm in present:
            idx = idx_lists[nm]
            m = beh_list[idx[0]]
            for k in idx[1:]:
                m = m + beh_list[k]
            parts.append(m * jnp.float32(1.0 / len(idx)))
        # ONE lane-dense (N, T*D) operand and ONE (N,TD)@(TD,TD) block-diagonal
        # matmul (replaces T separate (N,D)@(D,D) MXU under-fills).
        m_cat = jnp.concatenate(parts, axis=1)
        y = jnp.dot(m_cat, w_ref[...], preferred_element_type=jnp.float32)
        z = jnp.maximum(y, 0.0)               # ReLU
        zt = {nm: z[:, t * D:(t + 1) * D] for t, nm in enumerate(present)}

        def denoise(e1, e2):
            t1 = jnp.sum(e1 * e2, axis=1, keepdims=True)
            t2 = jnp.sum(e2 * e2, axis=1, keepdims=True) + 1e-20
            return e1 - (t1 / t2) * e2        # exact divide (reference parity)

        # denoise_flag=True: IP ⟂ EN, IN ⟂ EP
        if ("IP" in zt) and ("EN" in zt):
            zt["IP"] = denoise(zt["IP"], zt["EN"])
        if ("IN" in zt) and ("EP" in zt):
            zt["IN"] = denoise(zt["IN"], zt["EP"])

        # SINGLE unmasked lane-dense (N, T*D) store (no 32-lane masked stores).
        out_ref[...] = jnp.concatenate([zt[nm] for nm in present], axis=1)

    combine_denoise(u_beh, wu_ref, u_emb_ref)
    combine_denoise(i_beh, wv_ref, i_emb_ref)


def fused_feedback_forward(adjs, user_emb0, item_emb0, wu, wv, *,
                           enc_idx, present, idx_lists, n_layers):
    """adjs: (K_beh, U, I) f32; user_emb0: (K_enc, U, D); item_emb0: (K_enc, I, D);
    wu/wv: (T*D, T*D) block-diagonal fine-grained weights (user / item)."""
    K_beh, U, I = adjs.shape
    K_enc, _, D = user_emb0.shape
    T = len(present)
    TD = T * D

    kernel = functools.partial(_fused_kernel, n_layers, enc_idx, present,
                               idx_lists, D)
    return pl.pallas_call(
        kernel,
        out_shape=(
            jax.ShapeDtypeStruct((K_beh, U, D), jnp.float32),   # per-behavior user
            jax.ShapeDtypeStruct((K_beh, I, D), jnp.float32),   # per-behavior item
            jax.ShapeDtypeStruct((U, TD), jnp.float32),         # final user (lane-dense)
            jax.ShapeDtypeStruct((I, TD), jnp.float32),         # final item (lane-dense)
        ),
        grid=(1,),
        in_specs=[
            pl.BlockSpec((K_beh, U, I), lambda i: (0, 0, 0)),
            pl.BlockSpec((K_enc, U, D), lambda i: (0, 0, 0)),
            pl.BlockSpec((K_enc, I, D), lambda i: (0, 0, 0)),
            pl.BlockSpec((TD, TD), lambda i: (0, 0)),
            pl.BlockSpec((TD, TD), lambda i: (0, 0)),
        ],
        out_specs=(
            pl.BlockSpec((K_beh, U, D), lambda i: (0, 0, 0)),
            pl.BlockSpec((K_beh, I, D), lambda i: (0, 0, 0)),
            pl.BlockSpec((U, TD), lambda i: (0, 0)),
            pl.BlockSpec((I, TD), lambda i: (0, 0)),
        ),
        compiler_params=pltpu.CompilerParams(
            dimension_semantics=("arbitrary",)),
    )(adjs, user_emb0, item_emb0, wu, wv)


# -----------------------------------------------------------------------------
# Model glue (plain JAX, jitted): parameter setup + orchestration
# -----------------------------------------------------------------------------
def xavier_uniform(key, shape):
    fan_out, fan_in = shape[0], shape[1]
    bound = (6.0 / (fan_in + fan_out)) ** 0.5
    return jax.random.uniform(key, shape, jnp.float32, -bound, bound)


def feedback_encoder_forward(params, multi_u2i_adjs, *, behavior_type,
                             n_layers):
    behavior_type = list(behavior_type)
    coarse_types = sorted(set(behavior_type))            # torch.unique (sorted)
    enc_idx = tuple(coarse_types.index(bt) for bt in behavior_type)  # static

    user_emb0 = jnp.stack([e["user_emb"] for e in params["encoders"]], axis=0)
    item_emb0 = jnp.stack([e["item_emb"] for e in params["encoders"]], axis=0)
    _, U, D = user_emb0.shape
    I = item_emb0.shape[1]

    # static feedback-type bookkeeping (EP/IP/EN/IN order as in the reference)
    present = []
    idx_lists = {}
    for t in (0, 1, 2, 3):
        idx = tuple(k for k, bt in enumerate(behavior_type) if bt == t)
        if idx:
            present.append(_NAMES[t])
            idx_lists[_NAMES[t]] = idx
    present = tuple(present)
    T = len(present)
    TD = T * D

    # block-diagonal fine-grained weights (assembled once, host/XLA side)
    def block_diag(mats):
        W = jnp.zeros((TD, TD), jnp.float32)
        for t, m in enumerate(mats):
            W = W.at[t * D:(t + 1) * D, t * D:(t + 1) * D].set(m)
        return W

    wu = block_diag([params[f"fine_weight_{nm}_u"] for nm in present])
    wv = block_diag([params[f"fine_weight_{nm}_v"] for nm in present])

    # --- ONE fused pallas_call for the whole forward ---
    (user_each_beh, item_each_beh,
     user_embedding, item_embedding) = fused_feedback_forward(
        multi_u2i_adjs, user_emb0, item_emb0, wu, wv,
        enc_idx=enc_idx, present=present, idx_lists=idx_lists,
        n_layers=n_layers)

    # stacked per-feedback views are a free reshape of the concatenated output
    user_each_fb = user_embedding.reshape(U, T, D).transpose(1, 0, 2)
    item_each_fb = item_embedding.reshape(I, T, D).transpose(1, 0, 2)

    return {
        "user_embeddings_each_behavior": user_each_beh,
        "item_embeddings_each_behavior": item_each_beh,
        "user_embeddings_each_feedback": user_each_fb,
        "item_embeddings_each_feedback": item_each_fb,
        "user_embedding": user_embedding,
        "item_embedding": item_embedding,
    }


def init_params(key, num_users, num_items, dim, n_coarse_types):
    keys = jax.random.split(key, 2 * n_coarse_types + 8)
    params = {"encoders": []}
    for k in range(n_coarse_types):
        params["encoders"].append({
            "user_emb": xavier_uniform(keys[2 * k], (num_users, dim)),
            "item_emb": xavier_uniform(keys[2 * k + 1], (num_items, dim)),
        })
    base = 2 * n_coarse_types
    for j, nm in enumerate(("EP", "IP", "EN", "IN")):
        params[f"fine_weight_{nm}_u"] = xavier_uniform(keys[base + 2 * j],
                                                       (dim, dim))
        params[f"fine_weight_{nm}_v"] = xavier_uniform(keys[base + 2 * j + 1],
                                                       (dim, dim))
    return params


# -----------------------------------------------------------------------------
# Main
# -----------------------------------------------------------------------------
if __name__ == "__main__":
    num_users = 16
    num_items = 24
    dim_each_feedback = 32
    n_layers = 2
    behavior_type = [0, 1, 1, 2, 3]          # 5 behaviors, 4 coarse types
    n_coarse_types = len(set(behavior_type))

    root = jax.random.PRNGKey(0)
    k_params, k_adj = jax.random.split(root)
    params = init_params(k_params, num_users, num_items, dim_each_feedback,
                         n_coarse_types)

    # dense (symmetrically normalized) u2i adjacency per behavior
    # (the reference's fold-wise sparse spmm is mathematically a full adj @ emb)
    adj_keys = jax.random.split(k_adj, len(behavior_type))
    multi_u2i_adjs = []
    for ak in adj_keys:
        a = (jax.random.uniform(ak, (num_users, num_items)) > 0.7).astype(
            jnp.float32)
        deg_u = jnp.clip(a.sum(axis=1, keepdims=True), 1.0, None)
        deg_i = jnp.clip(a.sum(axis=0, keepdims=True), 1.0, None)
        multi_u2i_adjs.append(a / jnp.sqrt(deg_u) / jnp.sqrt(deg_i))
    multi_u2i_adjs = jnp.stack(multi_u2i_adjs, axis=0)  # (K_beh, U, I)

    fwd = jax.jit(functools.partial(feedback_encoder_forward,
                                    behavior_type=tuple(behavior_type),
                                    n_layers=n_layers))
    out = fwd(params, multi_u2i_adjs)
    jax.block_until_ready(out)

    assert out["user_embedding"].shape == (num_users, 4 * dim_each_feedback)
    assert out["item_embedding"].shape == (num_items, 4 * dim_each_feedback)
    assert out["user_embeddings_each_behavior"].shape == (
        len(behavior_type), num_users, dim_each_feedback)
    assert out["item_embeddings_each_behavior"].shape == (
        len(behavior_type), num_items, dim_each_feedback)
    assert out["user_embeddings_each_feedback"].shape == (
        4, num_users, dim_each_feedback)
    assert out["item_embeddings_each_feedback"].shape == (
        4, num_items, dim_each_feedback)

    print("KERNEL_OK")
</pallas_src>

<mosaic_0001>
module attributes {stable_mosaic.version = 11 : i64} {
  func.func @_fused_kernel(%arg0: i32, %arg1: memref<5x16x24xf32, #tpu.memory_space<vmem>>, %arg2: memref<4x16x32xf32, #tpu.memory_space<vmem>>, %arg3: memref<4x24x32xf32, #tpu.memory_space<vmem>>, %arg4: memref<128x128xf32, #tpu.memory_space<vmem>>, %arg5: memref<128x128xf32, #tpu.memory_space<vmem>>, %arg6: memref<5x16x32xf32, #tpu.memory_space<vmem>>, %arg7: memref<5x24x32xf32, #tpu.memory_space<vmem>>, %arg8: memref<16x128xf32, #tpu.memory_space<vmem>>, %arg9: memref<24x128xf32, #tpu.memory_space<vmem>>) attributes {dimension_semantics = [#tpu.dimension_semantics<arbitrary>], iteration_bounds = array<i64: 1>, scalar_prefetch = 0 : i64, scratch_operands = 0 : i64, tpu.core_type = #tpu.core_type<tc>, window_params = [{pipeline_mode = #tpu.pipeline_mode<synchronous>, transform_indices = @transform_0, window_bounds = array<i64: 5, 16, 24>}, {pipeline_mode = #tpu.pipeline_mode<synchronous>, transform_indices = @transform_1, window_bounds = array<i64: 4, 16, 32>}, {pipeline_mode = #tpu.pipeline_mode<synchronous>, transform_indices = @transform_2, window_bounds = array<i64: 4, 24, 32>}, {pipeline_mode = #tpu.pipeline_mode<synchronous>, transform_indices = @transform_3, window_bounds = array<i64: 128, 128>}, {pipeline_mode = #tpu.pipeline_mode<synchronous>, transform_indices = @transform_4, window_bounds = array<i64: 128, 128>}, {pipeline_mode = #tpu.pipeline_mode<synchronous>, transform_indices = @transform_5, window_bounds = array<i64: 5, 16, 32>}, {pipeline_mode = #tpu.pipeline_mode<synchronous>, transform_indices = @transform_6, window_bounds = array<i64: 5, 24, 32>}, {pipeline_mode = #tpu.pipeline_mode<synchronous>, transform_indices = @transform_7, window_bounds = array<i64: 16, 128>}, {pipeline_mode = #tpu.pipeline_mode<synchronous>, transform_indices = @transform_8, window_bounds = array<i64: 24, 128>}]} {
    %c0 = arith.constant 0 : index
    %c0_0 = arith.constant 0 : index
    %c0_1 = arith.constant 0 : index
    %0 = vector.load %arg1[%c0, %c0_0, %c0_1] : memref<5x16x24xf32, #tpu.memory_space<vmem>>, vector<1x16x24xf32>
    %1 = vector.shape_cast %0 : vector<1x16x24xf32> to vector<16x24xf32>
    %c0_2 = arith.constant 0 : index
    %c0_3 = arith.constant 0 : index
    %c0_4 = arith.constant 0 : index
    %2 = vector.load %arg2[%c0_2, %c0_3, %c0_4] : memref<4x16x32xf32, #tpu.memory_space<vmem>>, vector<1x16x32xf32>
    %3 = vector.shape_cast %2 : vector<1x16x32xf32> to vector<16x32xf32>
    %c0_5 = arith.constant 0 : index
    %c0_6 = arith.constant 0 : index
    %c0_7 = arith.constant 0 : index
    %4 = vector.load %arg3[%c0_5, %c0_6, %c0_7] : memref<4x24x32xf32, #tpu.memory_space<vmem>>, vector<1x24x32xf32>
    %5 = vector.shape_cast %4 : vector<1x24x32xf32> to vector<24x32xf32>
    %cst = arith.constant dense<0.000000e+00> : vector<16x32xf32>
    %6 = tpu.matmul %1, %5, %cst {dimension_numbers = #tpu.dot_dimension_numbers<[1], [0], [0], [1], [0, 0, 1, 1], [], []>} : vector<16x24xf32>, vector<24x32xf32>, vector<16x32xf32> -> vector<16x32xf32>
    %cst_8 = arith.constant dense<0.000000e+00> : vector<24x32xf32>
    %7 = tpu.matmul %1, %3, %cst_8 {dimension_numbers = #tpu.dot_dimension_numbers<[0], [0], [1], [1], [0, 1, 1, 1], [], []>} : vector<16x24xf32>, vector<16x32xf32>, vector<24x32xf32> -> vector<24x32xf32>
    %8 = arith.addf %3, %6 : vector<16x32xf32>
    %9 = arith.addf %5, %7 : vector<24x32xf32>
    %cst_9 = arith.constant dense<0.000000e+00> : vector<16x32xf32>
    %10 = tpu.matmul %1, %7, %cst_9 {dimension_numbers = #tpu.dot_dimension_numbers<[1], [0], [0], [1], [0, 0, 1, 1], [], []>} : vector<16x24xf32>, vector<24x32xf32>, vector<16x32xf32> -> vector<16x32xf32>
    %cst_10 = arith.constant dense<0.000000e+00> : vector<24x32xf32>
    %11 = tpu.matmul %1, %6, %cst_10 {dimension_numbers = #tpu.dot_dimension_numbers<[0], [0], [1], [1], [0, 1, 1, 1], [], []>} : vector<16x24xf32>, vector<16x32xf32>, vector<24x32xf32> -> vector<24x32xf32>
    %12 = arith.addf %8, %10 : vector<16x32xf32>
    %13 = arith.addf %9, %11 : vector<24x32xf32>
    %cst_11 = arith.constant 0.333333343 : f32
    %14 = vector.broadcast %cst_11 : f32 to vector<16x32xf32>
    %15 = arith.mulf %12, %14 : vector<16x32xf32>
    %cst_12 = arith.constant 0.333333343 : f32
    %16 = vector.broadcast %cst_12 : f32 to vector<24x32xf32>
    %17 = arith.mulf %13, %16 : vector<24x32xf32>
    %c0_13 = arith.constant 0 : index
    %c0_14 = arith.constant 0 : index
    %c0_15 = arith.constant 0 : index
    %18 = vector.load %arg6[%c0_13, %c0_14, %c0_15] : memref<5x16x32xf32, #tpu.memory_space<vmem>>, vector<1x16x32xf32>
    %19 = vector.shape_cast %18 : vector<1x16x32xf32> to vector<16x32xf32>
    %20 = vector.shape_cast %15 : vector<16x32xf32> to vector<1x16x32xf32>
    tpu.vector_store %arg6[%c0_13, %c0_14, %c0_15], %20 {strides = array<i32>} : memref<5x16x32xf32, #tpu.memory_space<vmem>>, vector<1x16x32xf32>,
    %c0_16 = arith.constant 0 : index
    %c0_17 = arith.constant 0 : index
    %c0_18 = arith.constant 0 : index
    %21 = vector.load %arg7[%c0_16, %c0_17, %c0_18] : memref<5x24x32xf32, #tpu.memory_space<vmem>>, vector<1x24x32xf32>
    %22 = vector.shape_cast %21 : vector<1x24x32xf32> to vector<24x32xf32>
    %23 = vector.shape_cast %17 : vector<24x32xf32> to vector<1x24x32xf32>
    tpu.vector_store %arg7[%c0_16, %c0_17, %c0_18], %23 {strides = array<i32>} : memref<5x24x32xf32, #tpu.memory_space<vmem>>, vector<1x24x32xf32>,
    %c1 = arith.constant 1 : index
    %c0_19 = arith.constant 0 : index
    %c0_20 = arith.constant 0 : index
    %24 = vector.load %arg1[%c1, %c0_19, %c0_20] : memref<5x16x24xf32, #tpu.memory_space<vmem>>, vector<1x16x24xf32>
    %25 = vector.shape_cast %24 : vector<1x16x24xf32> to vector<16x24xf32>
    %c1_21 = arith.constant 1 : index
    %c0_22 = arith.constant 0 : index
    %c0_23 = arith.constant 0 : index
    %26 = vector.load %arg2[%c1_21, %c0_22, %c0_23] : memref<4x16x32xf32, #tpu.memory_space<vmem>>, vector<1x16x32xf32>
    %27 = vector.shape_cast %26 : vector<1x16x32xf32> to vector<16x32xf32>
    %c1_24 = arith.constant 1 : index
    %c0_25 = arith.constant 0 : index
    %c0_26 = arith.constant 0 : index
    %28 = vector.load %arg3[%c1_24, %c0_25, %c0_26] : memref<4x24x32xf32, #tpu.memory_space<vmem>>, vector<1x24x32xf32>
    %29 = vector.shape_cast %28 : vector<1x24x32xf32> to vector<24x32xf32>
    %cst_27 = arith.constant dense<0.000000e+00> : vector<16x32xf32>
    %30 = tpu.matmul %25, %29, %cst_27 {dimension_numbers = #tpu.dot_dimension_numbers<[1], [0], [0], [1], [0, 0, 1, 1], [], []>} : vector<16x24xf32>, vector<24x32xf32>, vector<16x32xf32> -> vector<16x32xf32>
    %cst_28 = arith.constant dense<0.000000e+00> : vector<24x32xf32>
    %31 = tpu.matmul %25, %27, %cst_28 {dimension_numbers = #tpu.dot_dimension_numbers<[0], [0], [1], [1], [0, 1, 1, 1], [], []>} : vector<16x24xf32>, vector<16x32xf32>, vector<24x32xf32> -> vector<24x32xf32>
    %32 = arith.addf %27, %30 : vector<16x32xf32>
    %33 = arith.addf %29, %31 : vector<24x32xf32>
    %cst_29 = arith.constant dense<0.000000e+00> : vector<16x32xf32>
    %34 = tpu.matmul %25, %31, %cst_29 {dimension_numbers = #tpu.dot_dimension_numbers<[1], [0], [0], [1], [0, 0, 1, 1], [], []>} : vector<16x24xf32>, vector<24x32xf32>, vector<16x32xf32> -> vector<16x32xf32>
    %cst_30 = arith.constant dense<0.000000e+00> : vector<24x32xf32>
    %35 = tpu.matmul %25, %30, %cst_30 {dimension_numbers = #tpu.dot_dimension_numbers<[0], [0], [1], [1], [0, 1, 1, 1], [], []>} : vector<16x24xf32>, vector<16x32xf32>, vector<24x32xf32> -> vector<24x32xf32>
    %36 = arith.addf %32, %34 : vector<16x32xf32>
    %37 = arith.addf %33, %35 : vector<24x32xf32>
    %cst_31 = arith.constant 0.333333343 : f32
    %38 = vector.broadcast %cst_31 : f32 to vector<16x32xf32>
    %39 = arith.mulf %36, %38 : vector<16x32xf32>
    %cst_32 = arith.constant 0.333333343 : f32
    %40 = vector.broadcast %cst_32 : f32 to vector<24x32xf32>
    %41 = arith.mulf %37, %40 : vector<24x32xf32>
    %c1_33 = arith.constant 1 : index
    %c0_34 = arith.constant 0 : index
    %c0_35 = arith.constant 0 : index
    %42 = vector.load %arg6[%c1_33, %c0_34, %c0_35] : memref<5x16x32xf32, #tpu.memory_space<vmem>>, vector<1x16x32xf32>
    %43 = vector.shape_cast %42 : vector<1x16x32xf32> to vector<16x32xf32>
    %44 = vector.shape_cast %39 : vector<16x32xf32> to vector<1x16x32xf32>
    tpu.vector_store %arg6[%c1_33, %c0_34, %c0_35], %44 {strides = array<i32>} : memref<5x16x32xf32, #tpu.memory_space<vmem>>, vector<1x16x32xf32>,
    %c1_36 = arith.constant 1 : index
    %c0_37 = arith.constant 0 : index
    %c0_38 = arith.constant 0 : index
    %45 = vector.load %arg7[%c1_36, %c0_37, %c0_38] : memref<5x24x32xf32, #tpu.memory_space<vmem>>, vector<1x24x32xf32>
    %46 = vector.shape_cast %45 : vector<1x24x32xf32> to vector<24x32xf32>
    %47 = vector.shape_cast %41 : vector<24x32xf32> to vector<1x24x32xf32>
    tpu.vector_store %arg7[%c1_36, %c0_37, %c0_38], %47 {strides = array<i32>} : memref<5x24x32xf32, #tpu.memory_space<vmem>>, vector<1x24x32xf32>,
    %c2 = arith.constant 2 : index
    %c0_39 = arith.constant 0 : index
    %c0_40 = arith.constant 0 : index
    %48 = vector.load %arg1[%c2, %c0_39, %c0_40] : memref<5x16x24xf32, #tpu.memory_space<vmem>>, vector<1x16x24xf32>
    %49 = vector.shape_cast %48 : vector<1x16x24xf32> to vector<16x24xf32>
    %c1_41 = arith.constant 1 : index
    %c0_42 = arith.constant 0 : index
    %c0_43 = arith.constant 0 : index
    %50 = vector.load %arg2[%c1_41, %c0_42, %c0_43] : memref<4x16x32xf32, #tpu.memory_space<vmem>>, vector<1x16x32xf32>
    %51 = vector.shape_cast %50 : vector<1x16x32xf32> to vector<16x32xf32>
    %c1_44 = arith.constant 1 : index
    %c0_45 = arith.constant 0 : index
    %c0_46 = arith.constant 0 : index
    %52 = vector.load %arg3[%c1_44, %c0_45, %c0_46] : memref<4x24x32xf32, #tpu.memory_space<vmem>>, vector<1x24x32xf32>
    %53 = vector.shape_cast %52 : vector<1x24x32xf32> to vector<24x32xf32>
    %cst_47 = arith.constant dense<0.000000e+00> : vector<16x32xf32>
    %54 = tpu.matmul %49, %53, %cst_47 {dimension_numbers = #tpu.dot_dimension_numbers<[1], [0], [0], [1], [0, 0, 1, 1], [], []>} : vector<16x24xf32>, vector<24x32xf32>, vector<16x32xf32> -> vector<16x32xf32>
    %cst_48 = arith.constant dense<0.000000e+00> : vector<24x32xf32>
    %55 = tpu.matmul %49, %51, %cst_48 {dimension_numbers = #tpu.dot_dimension_numbers<[0], [0], [1], [1], [0, 1, 1, 1], [], []>} : vector<16x24xf32>, vector<16x32xf32>, vector<24x32xf32> -> vector<24x32xf32>
    %56 = arith.addf %51, %54 : vector<16x32xf32>
    %57 = arith.addf %53, %55 : vector<24x32xf32>
    %cst_49 = arith.constant dense<0.000000e+00> : vector<16x32xf32>
    %58 = tpu.matmul %49, %55, %cst_49 {dimension_numbers = #tpu.dot_dimension_numbers<[1], [0], [0], [1], [0, 0, 1, 1], [], []>} : vector<16x24xf32>, vector<24x32xf32>, vector<16x32xf32> -> vector<16x32xf32>
    %cst_50 = arith.constant dense<0.000000e+00> : vector<24x32xf32>
    %59 = tpu.matmul %49, %54, %cst_50 {dimension_numbers = #tpu.dot_dimension_numbers<[0], [0], [1], [1], [0, 1, 1, 1], [], []>} : vector<16x24xf32>, vector<16x32xf32>, vector<24x32xf32> -> vector<24x32xf32>
    %60 = arith.addf %56, %58 : vector<16x32xf32>
    %61 = arith.addf %57, %59 : vector<24x32xf32>
    %cst_51 = arith.constant 0.333333343 : f32
    %62 = vector.broadcast %cst_51 : f32 to vector<16x32xf32>
    %63 = arith.mulf %60, %62 : vector<16x32xf32>
    %cst_52 = arith.constant 0.333333343 : f32
    %64 = vector.broadcast %cst_52 : f32 to vector<24x32xf32>
    %65 = arith.mulf %61, %64 : vector<24x32xf32>
    %c2_53 = arith.constant 2 : index
    %c0_54 = arith.constant 0 : index
    %c0_55 = arith.constant 0 : index
    %66 = vector.load %arg6[%c2_53, %c0_54, %c0_55] : memref<5x16x32xf32, #tpu.memory_space<vmem>>, vector<1x16x32xf32>
    %67 = vector.shape_cast %66 : vector<1x16x32xf32> to vector<16x32xf32>
    %68 = vector.shape_cast %63 : vector<16x32xf32> to vector<1x16x32xf32>
    tpu.vector_store %arg6[%c2_53, %c0_54, %c0_55], %68 {strides = array<i32>} : memref<5x16x32xf32, #tpu.memory_space<vmem>>, vector<1x16x32xf32>,
    %c2_56 = arith.constant 2 : index
    %c0_57 = arith.constant 0 : index
    %c0_58 = arith.constant 0 : index
    %69 = vector.load %arg7[%c2_56, %c0_57, %c0_58] : memref<5x24x32xf32, #tpu.memory_space<vmem>>, vector<1x24x32xf32>
    %70 = vector.shape_cast %69 : vector<1x24x32xf32> to vector<24x32xf32>
    %71 = vector.shape_cast %65 : vector<24x32xf32> to vector<1x24x32xf32>
    tpu.vector_store %arg7[%c2_56, %c0_57, %c0_58], %71 {strides = array<i32>} : memref<5x24x32xf32, #tpu.memory_space<vmem>>, vector<1x24x32xf32>,
    %c3 = arith.constant 3 : index
    %c0_59 = arith.constant 0 : index
    %c0_60 = arith.constant 0 : index
    %72 = vector.load %arg1[%c3, %c0_59, %c0_60] : memref<5x16x24xf32, #tpu.memory_space<vmem>>, vector<1x16x24xf32>
    %73 = vector.shape_cast %72 : vector<1x16x24xf32> to vector<16x24xf32>
    %c2_61 = arith.constant 2 : index
    %c0_62 = arith.constant 0 : index
    %c0_63 = arith.constant 0 : index
    %74 = vector.load %arg2[%c2_61, %c0_62, %c0_63] : memref<4x16x32xf32, #tpu.memory_space<vmem>>, vector<1x16x32xf32>
    %75 = vector.shape_cast %74 : vector<1x16x32xf32> to vector<16x32xf32>
    %c2_64 = arith.constant 2 : index
    %c0_65 = arith.constant 0 : index
    %c0_66 = arith.constant 0 : index
    %76 = vector.load %arg3[%c2_64, %c0_65, %c0_66] : memref<4x24x32xf32, #tpu.memory_space<vmem>>, vector<1x24x32xf32>
    %77 = vector.shape_cast %76 : vector<1x24x32xf32> to vector<24x32xf32>
    %cst_67 = arith.constant dense<0.000000e+00> : vector<16x32xf32>
    %78 = tpu.matmul %73, %77, %cst_67 {dimension_numbers = #tpu.dot_dimension_numbers<[1], [0], [0], [1], [0, 0, 1, 1], [], []>} : vector<16x24xf32>, vector<24x32xf32>, vector<16x32xf32> -> vector<16x32xf32>
    %cst_68 = arith.constant dense<0.000000e+00> : vector<24x32xf32>
    %79 = tpu.matmul %73, %75, %cst_68 {dimension_numbers = #tpu.dot_dimension_numbers<[0], [0], [1], [1], [0, 1, 1, 1], [], []>} : vector<16x24xf32>, vector<16x32xf32>, vector<24x32xf32> -> vector<24x32xf32>
    %80 = arith.addf %75, %78 : vector<16x32xf32>
    %81 = arith.addf %77, %79 : vector<24x32xf32>
    %cst_69 = arith.constant dense<0.000000e+00> : vector<16x32xf32>
    %82 = tpu.matmul %73, %79, %cst_69 {dimension_numbers = #tpu.dot_dimension_numbers<[1], [0], [0], [1], [0, 0, 1, 1], [], []>} : vector<16x24xf32>, vector<24x32xf32>, vector<16x32xf32> -> vector<16x32xf32>
    %cst_70 = arith.constant dense<0.000000e+00> : vector<24x32xf32>
    %83 = tpu.matmul %73, %78, %cst_70 {dimension_numbers = #tpu.dot_dimension_numbers<[0], [0], [1], [1], [0, 1, 1, 1], [], []>} : vector<16x24xf32>, vector<16x32xf32>, vector<24x32xf32> -> vector<24x32xf32>
    %84 = arith.addf %80, %82 : vector<16x32xf32>
    %85 = arith.addf %81, %83 : vector<24x32xf32>
    %cst_71 = arith.constant 0.333333343 : f32
    %86 = vector.broadcast %cst_71 : f32 to vector<16x32xf32>
    %87 = arith.mulf %84, %86 : vector<16x32xf32>
    %cst_72 = arith.constant 0.333333343 : f32
    %88 = vector.broadcast %cst_72 : f32 to vector<24x32xf32>
    %89 = arith.mulf %85, %88 : vector<24x32xf32>
    %c3_73 = arith.constant 3 : index
    %c0_74 = arith.constant 0 : index
    %c0_75 = arith.constant 0 : index
    %90 = vector.load %arg6[%c3_73, %c0_74, %c0_75] : memref<5x16x32xf32, #tpu.memory_space<vmem>>, vector<1x16x32xf32>
    %91 = vector.shape_cast %90 : vector<1x16x32xf32> to vector<16x32xf32>
    %92 = vector.shape_cast %87 : vector<16x32xf32> to vector<1x16x32xf32>
    tpu.vector_store %arg6[%c3_73, %c0_74, %c0_75], %92 {strides = array<i32>} : memref<5x16x32xf32, #tpu.memory_space<vmem>>, vector<1x16x32xf32>,
    %c3_76 = arith.constant 3 : index
    %c0_77 = arith.constant 0 : index
    %c0_78 = arith.constant 0 : index
    %93 = vector.load %arg7[%c3_76, %c0_77, %c0_78] : memref<5x24x32xf32, #tpu.memory_space<vmem>>, vector<1x24x32xf32>
    %94 = vector.shape_cast %93 : vector<1x24x32xf32> to vector<24x32xf32>
    %95 = vector.shape_cast %89 : vector<24x32xf32> to vector<1x24x32xf32>
    tpu.vector_store %arg7[%c3_76, %c0_77, %c0_78], %95 {strides = array<i32>} : memref<5x24x32xf32, #tpu.memory_space<vmem>>, vector<1x24x32xf32>,
    %c4 = arith.constant 4 : index
    %c0_79 = arith.constant 0 : index
    %c0_80 = arith.constant 0 : index
    %96 = vector.load %arg1[%c4, %c0_79, %c0_80] : memref<5x16x24xf32, #tpu.memory_space<vmem>>, vector<1x16x24xf32>
    %97 = vector.shape_cast %96 : vector<1x16x24xf32> to vector<16x24xf32>
    %c3_81 = arith.constant 3 : index
    %c0_82 = arith.constant 0 : index
    %c0_83 = arith.constant 0 : index
    %98 = vector.load %arg2[%c3_81, %c0_82, %c0_83] : memref<4x16x32xf32, #tpu.memory_space<vmem>>, vector<1x16x32xf32>
    %99 = vector.shape_cast %98 : vector<1x16x32xf32> to vector<16x32xf32>
    %c3_84 = arith.constant 3 : index
    %c0_85 = arith.constant 0 : index
    %c0_86 = arith.constant 0 : index
    %100 = vector.load %arg3[%c3_84, %c0_85, %c0_86] : memref<4x24x32xf32, #tpu.memory_space<vmem>>, vector<1x24x32xf32>
    %101 = vector.shape_cast %100 : vector<1x24x32xf32> to vector<24x32xf32>
    %cst_87 = arith.constant dense<0.000000e+00> : vector<16x32xf32>
    %102 = tpu.matmul %97, %101, %cst_87 {dimension_numbers = #tpu.dot_dimension_numbers<[1], [0], [0], [1], [0, 0, 1, 1], [], []>} : vector<16x24xf32>, vector<24x32xf32>, vector<16x32xf32> -> vector<16x32xf32>
    %cst_88 = arith.constant dense<0.000000e+00> : vector<24x32xf32>
    %103 = tpu.matmul %97, %99, %cst_88 {dimension_numbers = #tpu.dot_dimension_numbers<[0], [0], [1], [1], [0, 1, 1, 1], [], []>} : vector<16x24xf32>, vector<16x32xf32>, vector<24x32xf32> -> vector<24x32xf32>
    %104 = arith.addf %99, %102 : vector<16x32xf32>
    %105 = arith.addf %101, %103 : vector<24x32xf32>
    %cst_89 = arith.constant dense<0.000000e+00> : vector<16x32xf32>
    %106 = tpu.matmul %97, %103, %cst_89 {dimension_numbers = #tpu.dot_dimension_numbers<[1], [0], [0], [1], [0, 0, 1, 1], [], []>} : vector<16x24xf32>, vector<24x32xf32>, vector<16x32xf32> -> vector<16x32xf32>
    %cst_90 = arith.constant dense<0.000000e+00> : vector<24x32xf32>
    %107 = tpu.matmul %97, %102, %cst_90 {dimension_numbers = #tpu.dot_dimension_numbers<[0], [0], [1], [1], [0, 1, 1, 1], [], []>} : vector<16x24xf32>, vector<16x32xf32>, vector<24x32xf32> -> vector<24x32xf32>
    %108 = arith.addf %104, %106 : vector<16x32xf32>
    %109 = arith.addf %105, %107 : vector<24x32xf32>
    %cst_91 = arith.constant 0.333333343 : f32
    %110 = vector.broadcast %cst_91 : f32 to vector<16x32xf32>
    %111 = arith.mulf %108, %110 : vector<16x32xf32>
    %cst_92 = arith.constant 0.333333343 : f32
    %112 = vector.broadcast %cst_92 : f32 to vector<24x32xf32>
    %113 = arith.mulf %109, %112 : vector<24x32xf32>
    %c4_93 = arith.constant 4 : index
    %c0_94 = arith.constant 0 : index
    %c0_95 = arith.constant 0 : index
    %114 = vector.load %arg6[%c4_93, %c0_94, %c0_95] : memref<5x16x32xf32, #tpu.memory_space<vmem>>, vector<1x16x32xf32>
    %115 = vector.shape_cast %114 : vector<1x16x32xf32> to vector<16x32xf32>
    %116 = vector.shape_cast %111 : vector<16x32xf32> to vector<1x16x32xf32>
    tpu.vector_store %arg6[%c4_93, %c0_94, %c0_95], %116 {strides = array<i32>} : memref<5x16x32xf32, #tpu.memory_space<vmem>>, vector<1x16x32xf32>,
    %c4_96 = arith.constant 4 : index
    %c0_97 = arith.constant 0 : index
    %c0_98 = arith.constant 0 : index
    %117 = vector.load %arg7[%c4_96, %c0_97, %c0_98] : memref<5x24x32xf32, #tpu.memory_space<vmem>>, vector<1x24x32xf32>
    %118 = vector.shape_cast %117 : vector<1x24x32xf32> to vector<24x32xf32>
    %119 = vector.shape_cast %113 : vector<24x32xf32> to vector<1x24x32xf32>
    tpu.vector_store %arg7[%c4_96, %c0_97, %c0_98], %119 {strides = array<i32>} : memref<5x24x32xf32, #tpu.memory_space<vmem>>, vector<1x24x32xf32>,
    %cst_99 = arith.constant 1.000000e+00 : f32
    %120 = vector.broadcast %cst_99 : f32 to vector<16x32xf32>
    %121 = arith.mulf %15, %120 : vector<16x32xf32>
    %122 = arith.addf %39, %63 : vector<16x32xf32>
    %cst_100 = arith.constant 5.000000e-01 : f32
    %123 = vector.broadcast %cst_100 : f32 to vector<16x32xf32>
    %124 = arith.mulf %122, %123 : vector<16x32xf32>
    %cst_101 = arith.constant 1.000000e+00 : f32
    %125 = vector.broadcast %cst_101 : f32 to vector<16x32xf32>
    %126 = arith.mulf %87, %125 : vector<16x32xf32>
    %cst_102 = arith.constant 1.000000e+00 : f32
    %127 = vector.broadcast %cst_102 : f32 to vector<16x32xf32>
    %128 = arith.mulf %111, %127 : vector<16x32xf32>
    %129 = tpu.concatenate %121, %124, %126, %128 in 1 : vector<16x32xf32>, vector<16x32xf32>, vector<16x32xf32>, vector<16x32xf32> -> vector<16x128xf32>
    %c0_103 = arith.constant 0 : index
    %c0_104 = arith.constant 0 : index
    %130 = vector.load %arg4[%c0_103, %c0_104] : memref<128x128xf32, #tpu.memory_space<vmem>>, vector<128x128xf32>
    %cst_105 = arith.constant dense<0.000000e+00> : vector<16x128xf32>
    %131 = tpu.matmul %129, %130, %cst_105 {dimension_numbers = #tpu.dot_dimension_numbers<[1], [0], [0], [1], [0, 0, 1, 1], [], []>} : vector<16x128xf32>, vector<128x128xf32>, vector<16x128xf32> -> vector<16x128xf32>
    %cst_106 = arith.constant 0.000000e+00 : f32
    %132 = vector.broadcast %cst_106 : f32 to vector<16x128xf32>
    %133 = arith.maximumf %131, %132 : vector<16x128xf32>
    %134 = vector.extract_strided_slice %133 {offsets = [0, 0], sizes = [16, 32], strides = [1, 1]} : vector<16x128xf32> to vector<16x32xf32>
    %135 = vector.extract_strided_slice %133 {offsets = [0, 32], sizes = [16, 32], strides = [1, 1]} : vector<16x128xf32> to vector<16x32xf32>
    %136 = vector.extract_strided_slice %133 {offsets = [0, 64], sizes = [16, 32], strides = [1, 1]} : vector<16x128xf32> to vector<16x32xf32>
    %137 = vector.extract_strided_slice %133 {offsets = [0, 96], sizes = [16, 32], strides = [1, 1]} : vector<16x128xf32> to vector<16x32xf32>
    %138 = arith.mulf %135, %136 : vector<16x32xf32>
    %cst_107 = arith.constant dense<0.000000e+00> : vector<16xf32>
    %139 = vector.multi_reduction <add>, %138, %cst_107 [1] : vector<16x32xf32> to vector<16xf32>
    %140 = vector.shape_cast %139 : vector<16xf32> to vector<16x1xf32>
    %141 = arith.mulf %136, %136 : vector<16x32xf32>
    %cst_108 = arith.constant dense<0.000000e+00> : vector<16xf32>
    %142 = vector.multi_reduction <add>, %141, %cst_108 [1] : vector<16x32xf32> to vector<16xf32>
    %143 = vector.shape_cast %142 : vector<16xf32> to vector<16x1xf32>
    %cst_109 = arith.constant 9.99999968E-21 : f32
    %144 = vector.broadcast %cst_109 : f32 to vector<16x1xf32>
    %145 = arith.addf %143, %144 : vector<16x1xf32>
    %146 = arith.divf %140, %145 : vector<16x1xf32>
    %147 = vector.broadcast %146 : vector<16x1xf32> to vector<16x32xf32>
    %148 = arith.mulf %147, %136 : vector<16x32xf32>
    %149 = arith.subf %135, %148 : vector<16x32xf32>
    %150 = arith.mulf %137, %134 : vector<16x32xf32>
    %cst_110 = arith.constant dense<0.000000e+00> : vector<16xf32>
    %151 = vector.multi_reduction <add>, %150, %cst_110 [1] : vector<16x32xf32> to vector<16xf32>
    %152 = vector.shape_cast %151 : vector<16xf32> to vector<16x1xf32>
    %153 = arith.mulf %134, %134 : vector<16x32xf32>
    %cst_111 = arith.constant dense<0.000000e+00> : vector<16xf32>
    %154 = vector.multi_reduction <add>, %153, %cst_111 [1] : vector<16x32xf32> to vector<16xf32>
    %155 = vector.shape_cast %154 : vector<16xf32> to vector<16x1xf32>
    %cst_112 = arith.constant 9.99999968E-21 : f32
    %156 = vector.broadcast %cst_112 : f32 to vector<16x1xf32>
    %157 = arith.addf %155, %156 : vector<16x1xf32>
    %158 = arith.divf %152, %157 : vector<16x1xf32>
    %159 = vector.broadcast %158 : vector<16x1xf32> to vector<16x32xf32>
    %160 = arith.mulf %159, %134 : vector<16x32xf32>
    %161 = arith.subf %137, %160 : vector<16x32xf32>
    %162 = tpu.concatenate %134, %149, %136, %161 in 1 : vector<16x32xf32>, vector<16x32xf32>, vector<16x32xf32>, vector<16x32xf32> -> vector<16x128xf32>
    %c0_113 = arith.constant 0 : index
    %c0_114 = arith.constant 0 : index
    %163 = vector.load %arg8[%c0_113, %c0_114] : memref<16x128xf32, #tpu.memory_space<vmem>>, vector<16x128xf32>
    tpu.vector_store %arg8[%c0_113, %c0_114], %162 {strides = array<i32>} : memref<16x128xf32, #tpu.memory_space<vmem>>, vector<16x128xf32>,
    %cst_115 = arith.constant 1.000000e+00 : f32
    %164 = vector.broadcast %cst_115 : f32 to vector<24x32xf32>
    %165 = arith.mulf %17, %164 : vector<24x32xf32>
    %166 = arith.addf %41, %65 : vector<24x32xf32>
    %cst_116 = arith.constant 5.000000e-01 : f32
    %167 = vector.broadcast %cst_116 : f32 to vector<24x32xf32>
    %168 = arith.mulf %166, %167 : vector<24x32xf32>
    %cst_117 = arith.constant 1.000000e+00 : f32
    %169 = vector.broadcast %cst_117 : f32 to vector<24x32xf32>
    %170 = arith.mulf %89, %169 : vector<24x32xf32>
    %cst_118 = arith.constant 1.000000e+00 : f32
    %171 = vector.broadcast %cst_118 : f32 to vector<24x32xf32>
    %172 = arith.mulf %113, %171 : vector<24x32xf32>
    %173 = tpu.concatenate %165, %168, %170, %172 in 1 : vector<24x32xf32>, vector<24x32xf32>, vector<24x32xf32>, vector<24x32xf32> -> vector<24x128xf32>
    %c0_119 = arith.constant 0 : index
    %c0_120 = arith.constant 0 : index
    %174 = vector.load %arg5[%c0_119, %c0_120] : memref<128x128xf32, #tpu.memory_space<vmem>>, vector<128x128xf32>
    %cst_121 = arith.constant dense<0.000000e+00> : vector<24x128xf32>
    %175 = tpu.matmul %173, %174, %cst_121 {dimension_numbers = #tpu.dot_dimension_numbers<[1], [0], [0], [1], [0, 0, 1, 1], [], []>} : vector<24x128xf32>, vector<128x128xf32>, vector<24x128xf32> -> vector<24x128xf32>
    %cst_122 = arith.constant 0.000000e+00 : f32
    %176 = vector.broadcast %cst_122 : f32 to vector<24x128xf32>
    %177 = arith.maximumf %175, %176 : vector<24x128xf32>
    %178 = vector.extract_strided_slice %177 {offsets = [0, 0], sizes = [24, 32], strides = [1, 1]} : vector<24x128xf32> to vector<24x32xf32>
    %179 = vector.extract_strided_slice %177 {offsets = [0, 32], sizes = [24, 32], strides = [1, 1]} : vector<24x128xf32> to vector<24x32xf32>
    %180 = vector.extract_strided_slice %177 {offsets = [0, 64], sizes = [24, 32], strides = [1, 1]} : vector<24x128xf32> to vector<24x32xf32>
    %181 = vector.extract_strided_slice %177 {offsets = [0, 96], sizes = [24, 32], strides = [1, 1]} : vector<24x128xf32> to vector<24x32xf32>
    %182 = arith.mulf %179, %180 : vector<24x32xf32>
    %cst_123 = arith.constant dense<0.000000e+00> : vector<24xf32>
    %183 = vector.multi_reduction <add>, %182, %cst_123 [1] : vector<24x32xf32> to vector<24xf32>
    %184 = vector.shape_cast %183 : vector<24xf32> to vector<24x1xf32>
    %185 = arith.mulf %180, %180 : vector<24x32xf32>
    %cst_124 = arith.constant dense<0.000000e+00> : vector<24xf32>
    %186 = vector.multi_reduction <add>, %185, %cst_124 [1] : vector<24x32xf32> to vector<24xf32>
    %187 = vector.shape_cast %186 : vector<24xf32> to vector<24x1xf32>
    %cst_125 = arith.constant 9.99999968E-21 : f32
    %188 = vector.broadcast %cst_125 : f32 to vector<24x1xf32>
    %189 = arith.addf %187, %188 : vector<24x1xf32>
    %190 = arith.divf %184, %189 : vector<24x1xf32>
    %191 = vector.broadcast %190 : vector<24x1xf32> to vector<24x32xf32>
    %192 = arith.mulf %191, %180 : vector<24x32xf32>
    %193 = arith.subf %179, %192 : vector<24x32xf32>
    %194 = arith.mulf %181, %178 : vector<24x32xf32>
    %cst_126 = arith.constant dense<0.000000e+00> : vector<24xf32>
    %195 = vector.multi_reduction <add>, %194, %cst_126 [1] : vector<24x32xf32> to vector<24xf32>
    %196 = vector.shape_cast %195 : vector<24xf32> to vector<24x1xf32>
    %197 = arith.mulf %178, %178 : vector<24x32xf32>
    %cst_127 = arith.constant dense<0.000000e+00> : vector<24xf32>
    %198 = vector.multi_reduction <add>, %197, %cst_127 [1] : vector<24x32xf32> to vector<24xf32>
    %199 = vector.shape_cast %198 : vector<24xf32> to vector<24x1xf32>
    %cst_128 = arith.constant 9.99999968E-21 : f32
    %200 = vector.broadcast %cst_128 : f32 to vector<24x1xf32>
    %201 = arith.addf %199, %200 : vector<24x1xf32>
    %202 = arith.divf %196, %201 : vector<24x1xf32>
    %203 = vector.broadcast %202 : vector<24x1xf32> to vector<24x32xf32>
    %204 = arith.mulf %203, %178 : vector<24x32xf32>
    %205 = arith.subf %181, %204 : vector<24x32xf32>
    %206 = tpu.concatenate %178, %193, %180, %205 in 1 : vector<24x32xf32>, vector<24x32xf32>, vector<24x32xf32>, vector<24x32xf32> -> vector<24x128xf32>
    %c0_129 = arith.constant 0 : index
    %c0_130 = arith.constant 0 : index
    %207 = vector.load %arg9[%c0_129, %c0_130] : memref<24x128xf32, #tpu.memory_space<vmem>>, vector<24x128xf32>
    tpu.vector_store %arg9[%c0_129, %c0_130], %206 {strides = array<i32>} : memref<24x128xf32, #tpu.memory_space<vmem>>, vector<24x128xf32>,
    return
  }
  func.func @transform_0(%arg0: i32) -> (i32, i32, i32) {
    %c0_i32 = arith.constant 0 : i32
    %c0_i32_0 = arith.constant 0 : i32
    %c0_i32_1 = arith.constant 0 : i32
    %c0_i32_2 = arith.constant 0 : i32
    return %c0_i32, %c0_i32_0, %c0_i32_1 : i32, i32, i32
  }
  func.func @transform_1(%arg0: i32) -> (i32, i32, i32) {
    %c0_i32 = arith.constant 0 : i32
    %c0_i32_0 = arith.constant 0 : i32
    %c0_i32_1 = arith.constant 0 : i32
    %c0_i32_2 = arith.constant 0 : i32
    return %c0_i32, %c0_i32_0, %c0_i32_1 : i32, i32, i32
  }
  func.func @transform_2(%arg0: i32) -> (i32, i32, i32) {
    %c0_i32 = arith.constant 0 : i32
    %c0_i32_0 = arith.constant 0 : i32
    %c0_i32_1 = arith.constant 0 : i32
    %c0_i32_2 = arith.constant 0 : i32
    return %c0_i32, %c0_i32_0, %c0_i32_1 : i32, i32, i32
  }
  func.func @transform_3(%arg0: i32) -> (i32, i32) {
    %c0_i32 = arith.constant 0 : i32
    %c0_i32_0 = arith.constant 0 : i32
    %c0_i32_1 = arith.constant 0 : i32
    return %c0_i32, %c0_i32_0 : i32, i32
  }
  func.func @transform_4(%arg0: i32) -> (i32, i32) {
    %c0_i32 = arith.constant 0 : i32
    %c0_i32_0 = arith.constant 0 : i32
    %c0_i32_1 = arith.constant 0 : i32
    return %c0_i32, %c0_i32_0 : i32, i32
  }
  func.func @transform_5(%arg0: i32) -> (i32, i32, i32) {
    %c0_i32 = arith.constant 0 : i32
    %c0_i32_0 = arith.constant 0 : i32
    %c0_i32_1 = arith.constant 0 : i32
    %c0_i32_2 = arith.constant 0 : i32
    return %c0_i32, %c0_i32_0, %c0_i32_1 : i32, i32, i32
  }
  func.func @transform_6(%arg0: i32) -> (i32, i32, i32) {
    %c0_i32 = arith.constant 0 : i32
    %c0_i32_0 = arith.constant 0 : i32
    %c0_i32_1 = arith.constant 0 : i32
    %c0_i32_2 = arith.constant 0 : i32
    return %c0_i32, %c0_i32_0, %c0_i32_1 : i32, i32, i32
  }
  func.func @transform_7(%arg0: i32) -> (i32, i32) {
    %c0_i32 = arith.constant 0 : i32
    %c0_i32_0 = arith.constant 0 : i32
    %c0_i32_1 = arith.constant 0 : i32
    return %c0_i32, %c0_i32_0 : i32, i32
  }
  func.func @transform_8(%arg0: i32) -> (i32, i32) {
    %c0_i32 = arith.constant 0 : i32
    %c0_i32_0 = arith.constant 0 : i32
    %c0_i32_1 = arith.constant 0 : i32
    return %c0_i32, %c0_i32_0 : i32, i32
  }
}

</mosaic_0001>

<bundles_post_ra>
// kernel: feedback_encoder_forward.1
= control target key start
LH: loop header
LB: loop body
LE: loop exit
PB: predicated region body
PF: predicated region fallthrough
CT: control target
= control target key end

     0   :  { %14 = vsyncpa [#allocation3], 0  ;;  %s2408_s0 = inlined_call_operand.vmem [shape: f32[5,16,24], index: 0, kind: input, shape index: {}]   ;;  %s2409_s1 = inlined_call_operand.vmem [shape: f32[4,16,32], index: 1, kind: input, shape index: {}]   ;;  %s2410_s2 = inlined_call_operand.vmem [shape: f32[4,24,32], index: 2, kind: input, shape index: {}]   ;;  %s2411_s3 = inlined_call_operand.vmem [shape: f32[128,128], index: 3, kind: input, shape index: {}]   ;;  %s2412_s4 = inlined_call_operand.vmem [shape: f32[128,128], index: 4, kind: input, shape index: {}]   ;;  %s2413_s5 = inlined_call_operand.hbm [shape: f32[5,16,32], index: 5, kind: output, shape index: {0}]   ;;  %s2414_s6 = inlined_call_operand.hbm [shape: f32[5,24,32], index: 6, kind: output, shape index: {1}]   ;;  %s2415_s7 = inlined_call_operand.vmem [shape: f32[16,128], index: 7, kind: output, shape index: {2}]   ;;  %s2416_s8 = inlined_call_operand.vmem [shape: f32[24,128], index: 8, kind: output, shape index: {3}]  }
   0x1   :  { %v1752_v0 = vld [vmem:[%s2408_s0] sm:$0xff]  ;;  %v1757_v1 = vld [vmem:[%s2410_s2 + $0x10] sm:$0xff]  ;;  %v31_v2 = vld [vmem:[%s2410_s2 + $0x8] sm:$0xff] }
   0x2   :  { %63 = vxpose.xlu0.b32.start [1/2] (short) (narrow) %v1752_v0, 24  ;;  %53 = vmatpush.msra.mxu0 %v1757_v1 }
   0x3   :  { %15 = vsyncpa [#allocation5], 0  ;;  %v30_v3 = vld [vmem:[%s2410_s2] sm:$0xff]  ;;  %vm33_vm0 = vcmask 195584   ;;  %v1770_v4 = vld [vmem:[%s2408_s0 + $0x8] sm:$0xff]  ;;  %vm95_vm1 = vcmask 130048  }
   0x4   :  { %54 = vmatpush.msra.mxu0 %v31_v2  ;;  %v1780_v5 = vld [vmem:[%s2409_s1 + $0x8] sm:$0xff]  ;;  %v28_v6 = vld [vmem:[%s2409_s1] sm:$0xff]  ;;  %v1791_v9 = vld [vmem:[%s2408_s0 + $0x10] sm:$0xff]  ;;  %vm195_vm2 = vcmask 261120   ;;  %s1697_s17 = smov 32   ;;  %s1698_s20 = smov 64  }
   0x5   :  { %119 = vmatpush.msra.mxu2 %v1780_v5  ;;  %240 = vxpose.xlu1.b32.start [1/2] (short) (narrow) %v1791_v9, 24  ;;  %v1800_v11 = vld [vmem:[%s2408_s0 + $0x18] sm:$0xff]  ;;  %v1806_v12 = vld [vmem:[%s2410_s2 + $0x28] sm:$0xff]  ;;  %v1811_v13 = vld [vmem:[%s2410_s2 + $0x20] sm:$0xff]  ;;  %vm937_vm3 = vcmask 523264   ;;  %vm940_vm4 = vcmask 785408  }
   0x6   :  { %55 = vmatpush.msra.mxu0 %v30_v3  ;;  %v1817_v14 = vld [vmem:[%s2410_s2 + $0x18] sm:$0xff]  ;;  %v1851_v32 = vld [vmem:[%s2408_s0 + $0x20] sm:$0xff]  ;;  %v1872_v40 = vld [vmem:[%s2409_s1 + $0x10] sm:$0xff]  ;;  %s1471_s18 = sshll.u32 %s2413_s5, 4  ;;  %s1701_s19 = smov [#allocation4]   ;;  %s1472_s18 = int_to_ptr.hbm [resolvable:$true] %s1471_s18 }
   0x7   :  { %1509 = vmatmul.msk.f32.vlgmr.msra.gmra.mxu0 %vm33_vm0, %v1752_v0  ;;  %120 = vmatpush.msra.mxu2 %v28_v6  ;;  %v1863_v38 = vld [vmem:[%s2409_s1 + $0x18] sm:$0xff]  ;;  %v1877_v41 = vld [vmem:[%s2408_s0 + $0x28] sm:$0xff]  ;;  %v1909_v52 = vld [vmem:[%s2408_s0 + $0x30] sm:$0xff]  ;;  %s1482_s21 = sshll.u32 %s1701_s19, 4  ;;  %s1484_s24 = sshll.u32 %s2414_s6, 4  ;;  %s1483_s21 = int_to_ptr.vmem [resolvable:$true] %s1482_s21  ;;  %s1485_s24 = int_to_ptr.hbm [resolvable:$true] %s1484_s24 }
   0x8   :  { %230 = vmatpush.msrb.mxu0 %v1806_v12  ;;  %415 = vxpose.xlu2.b32.start [1/2] (short) (narrow) %v1851_v32, 24  ;;  %v1921_v58 = vld [vmem:[%s2408_s0 + $0x38] sm:$0xff]  ;;  %s1702_s25 = smov 128   ;;  %s1703_s26 = smov 8  }
   0xa   :  { %64 = vxpose.xlu0.b32.end [2/2] (short) (narrow) %v1770_v4, 24  ;;  %231 = vmatpush.msrb.mxu0 %v1811_v13 }
   0xc   :  { %232 = vmatpush.msrb.mxu0 %v1817_v14 }
   0xd   :  { %241 = vxpose.xlu1.b32.end [2/2] (short) (narrow) %v1800_v11, 24 }
   0xe   :  { %405 = vmatpush.msra.mxu0 %v1806_v12 }
   0xf   :  { %1510 = vmatmul.msk.f32.gmra.mxu0 %vm33_vm0, %v1770_v4 }
  0x10   :  { %406 = vmatpush.msra.mxu0 %v1811_v13  ;;  %416 = vxpose.xlu2.b32.end [2/2] (short) (narrow) %v1877_v41, 24 }
  0x12   :  { %407 = vmatpush.msra.mxu0 %v1817_v14 }
  0x17   :  { %1526 = vmatmul.msk.f32.vlgmr.msrb.gmra.mxu0 %vm33_vm0, %v1791_v9 }
  0x1a   :  { %592 = vxpose.xlu0.b32.start [1/2] (short) (narrow) %v1909_v52, 24 }
  0x1f   :  { %1527 = vmatmul.msk.f32.gmra.mxu0 %vm33_vm0, %v1800_v11 }
  0x22   :  { %593 = vxpose.xlu0.b32.end [2/2] (short) (narrow) %v1921_v58, 24 }
  0x27   :  { %1543 = vmatmul.msk.f32.vlgmr.msra.gmra.mxu0 %vm33_vm0, %v1851_v32 }
  0x2f   :  { %1544 = vmatmul.msk.f32.gmra.mxu0 %vm33_vm0, %v1877_v41 }
  0x84   :  { %v57_v7 = vpop.f32.mrf.mxu0 }
  0x85   :  { %v1786_v8 = vadd.f32 %v57_v7, %v28_v6 }
  0x8c   :  { %v1794_v10 = vpop.f32.mrf.mxu0 }
  0x8d   :  { %173 = vmatpush.msra.mxu3 %v1794_v10  ;;  %v132_v45 = vadd.f32 %v1794_v10, %v1780_v5 }
  0x8f   :  { %174 = vmatpush.msra.mxu3 %v57_v7  ;;  %v1941_v7 = vld [vmem:[%s2410_s2 + $0x40] sm:$0xff] }
  0x90   :  { %582 = vmatpush.msrb.mxu0 %v1941_v7 }
  0x94   :  { %v1834_v18 = vpop.f32.mrf.mxu0 }
  0x95   :  { %v307_v10 = vadd.f32 %v1872_v40, %v1834_v18 }
  0x9c   :  { %v1836_v19 = vpop.f32.mrf.mxu0 }
  0x9d   :  { %349 = vmatpush.msrb.mxu3 %v1836_v19 }
  0x9f   :  { %350 = vmatpush.msrb.mxu3 %v1834_v18 }
  0xa1   :  { %v431_v53 = vpop.trf.xlu2 }
  0xa4   :  { %v1898_v46 = vpop.f32.mrf.mxu0 }
  0xa6   :  { %v79_v15 = vpop.trf.xlu0 }
  0xa7   :  { %1511 = vmatmul.msk.f32.vlgmr.msra.gmra.mxu2 %vm95_vm1, %v79_v15  ;;  %1516 = vmatmul.msk.f32.vlgmr.msra.gmra.mxu3 %vm95_vm1, %v79_v15 }
  0xa9   :  { %v256_v23 = vpop.trf.xlu1  ;;  %v432_v59 = vpop.trf.xlu2 }
  0xac   :  { %v1904_v51 = vpop.f32.mrf.mxu0 }
  0xad   :  { %524 = vmatpush.msra.mxu3 %v1904_v51 }
  0xae   :  { %v80_v16 = vpop.trf.xlu0 }
  0xaf   :  { %1512 = vmatmul.msk.f32.gmra.mxu2 %vm95_vm1, %v80_v16  ;;  %1517 = vmatmul.msk.f32.gmra.mxu3 %vm95_vm1, %v80_v16 }
  0xb0   :  { %525 = vmatpush.msra.mxu3 %v1898_v46 }
  0xb1   :  { %v257_v29 = vpop.trf.xlu1 }
  0xb6   :  { %v81_v17 = vpop.trf.xlu0 }
  0xb7   :  { %1513 = vmatmul.msk.f32.gmra.mxu2 %vm95_vm1, %v81_v17  ;;  %1518 = vmatmul.msk.f32.gmra.mxu3 %vm95_vm1, %v81_v17 }
  0xb9   :  { %v258_v36 = vpop.trf.xlu1 }
  0xbf   :  { %1533 = vmatmul.msk.f32.vlgmr.msrb.gmra.mxu3 %vm95_vm1, %v256_v23 }
  0xc7   :  { %1534 = vmatmul.msk.f32.gmra.mxu3 %vm95_vm1, %v257_v29 }
  0xcf   :  { %1535 = vmatmul.msk.f32.gmra.mxu3 %vm95_vm1, %v258_v36 }
  0xd7   :  { %1550 = vmatmul.msk.f32.vlgmr.msra.gmra.mxu3 %vm95_vm1, %v431_v53 }
  0xdf   :  { %1551 = vmatmul.msk.f32.gmra.mxu3 %vm95_vm1, %v432_v59 }
 0x12a   :  { %v122_v20 = vpop.f32.mrf.mxu2  ;;  %v176_v21 = vpop.f32.mrf.mxu3 }
 0x12b   :  { %v133_v22 = vadd.f32 %v122_v20, %v30_v3 }
 0x12d   :  { %v187_v24 = vadd.f32 %v176_v21, %v133_v22  ;;  %v1555_v22 = vld [vmem:[%s2409_s1 + $0x20] sm:$0xff] }
 0x12f   :  { %v1841_v25 = vmul.f32 0.33333334, %v187_v24 }
 0x131   :  { %198 = vst.msk [vmem:[#allocation4] sm:$0xff] %vm195_vm2, %v1841_v25 }
 0x132   :  { %v125_v26 = vpop.f32.mrf.mxu2  ;;  %v179_v27 = vpop.f32.mrf.mxu3 }
 0x133   :  { %v134_v28 = vadd.f32 %v125_v26, %v31_v2 }
 0x135   :  { %v188_v30 = vadd.f32 %v179_v27, %v134_v28  ;;  %v608_v28 = vpop.trf.xlu0 }
 0x137   :  { %v1846_v31 = vmul.f32 0.33333334, %v188_v30 }
 0x139   :  { %199 = vst.msk [vmem:[#allocation4 + $0x8] sm:$0xff] %vm195_vm2, %v1846_v31 }
 0x13a   :  { %v128_v33 = vpop.f32.mrf.mxu2  ;;  %v182_v35 = vpop.f32.mrf.mxu3 }
 0x13b   :  { %v135_v34 = vadd.f32 %v128_v33, %v1757_v1  ;;  %149 = vmatpush.msrb.mxu2 %v128_v33  ;;  %v433_v1 = vpop.trf.xlu2 }
 0x13c   :  { %1552 = vmatmul.msk.f32.gmra.mxu3 %vm95_vm1, %v433_v1 }
 0x13d   :  { %v189_v37 = vadd.f32 %v182_v35, %v135_v34  ;;  %150 = vmatpush.msrb.mxu2 %v125_v26 }
 0x13f   :  { %v1865_v39 = vmul.f32 0.33333334, %v189_v37  ;;  %151 = vmatpush.msrb.mxu2 %v122_v20  ;;  %v308_v20 = vadd.f32 %v1863_v38, %v1836_v19  ;;  %v1989_v19 = vld [vmem:[%s2408_s0 + $0x40] sm:$0xff]  ;;  %v609_v37 = vpop.trf.xlu0 }
 0x140   :  { %1514 = vmatmul.msk.f32.vlgmr.msrb.gmra.mxu2 %vm33_vm0, %v1752_v0  ;;  %769 = vxpose.xlu1.b32.start [1/2] (short) (narrow) %v1989_v19, 24 }
 0x141   :  { %200 = vst.msk [vmem:[#allocation4 + $0x10] sm:$0xff] %vm195_vm2, %v1865_v39  ;;  %295 = vmatpush.msra.mxu2 %v1863_v38 }
 0x142   :  { %v352_v50 = vpop.f32.mrf.mxu3 }
 0x143   :  { %296 = vmatpush.msra.mxu2 %v1872_v40 }
 0x148   :  { %1515 = vmatmul.msk.f32.gmra.mxu2 %vm33_vm0, %v1770_v4 }
 0x14a   :  { %v355_v61 = vpop.f32.mrf.mxu3 }
 0x150   :  { %1528 = vmatmul.msk.f32.vlgmr.msra.gmra.mxu2 %vm95_vm1, %v256_v23 }
 0x152   :  { %v358_v4 = vpop.f32.mrf.mxu3 }
 0x158   :  { %1529 = vmatmul.msk.f32.gmra.mxu2 %vm95_vm1, %v257_v29 }
 0x15a   :  { %v527_v26 = vpop.f32.mrf.mxu3 }
 0x160   :  { %1530 = vmatmul.msk.f32.gmra.mxu2 %vm95_vm1, %v258_v36  ;;  %v2000_v36 = vld [vmem:[%s2408_s0 + $0x48] sm:$0xff] }
 0x161   :  { %770 = vxpose.xlu1.b32.end [2/2] (short) (narrow) %v2000_v36, 24 }
 0x162   :  { %v530_v35 = vpop.f32.mrf.mxu3 }
 0x1c3   :  { %v153_v42 = vpop.f32.mrf.mxu2 }
 0x1c4   :  { %v185_v43 = vadd.f32 %v153_v42, %v1786_v8  ;;  %v1946_v8 = vld [vmem:[%s2410_s2 + $0x38] sm:$0xff] }
 0x1c5   :  { %583 = vmatpush.msrb.mxu0 %v1946_v8 }
 0x1c6   :  { %v1892_v44 = vmul.f32 0.33333334, %v185_v43 }
 0x1c8   :  { %196 = vst.msk [vmem:[#allocation2] sm:$0xff] %vm195_vm2, %v1892_v44 }
 0x1cb   :  { %v156_v47 = vpop.f32.mrf.mxu2 }
 0x1cc   :  { %v186_v48 = vadd.f32 %v156_v47, %v132_v45 }
 0x1ce   :  { %v1900_v49 = vmul.f32 0.33333334, %v186_v48  ;;  %v533_v48 = vpop.f32.mrf.mxu3 }
 0x1d0   :  { %197 = vst.msk [vmem:[#allocation2 + $0x8] sm:$0xff] %vm195_vm2, %v1900_v49 }
 0x1d3   :  { %v298_v54 = vpop.f32.mrf.mxu2 }
 0x1d4   :  { %v309_v55 = vadd.f32 %v1817_v14, %v298_v54 }
 0x1d6   :  { %v363_v56 = vadd.f32 %v352_v50, %v309_v55  ;;  %v2011_v55 = vld [vmem:[%s2409_s1 + $0x28] sm:$0xff] }
 0x1d8   :  { %v1916_v57 = vmul.f32 0.33333334, %v363_v56  ;;  %v2026_v56 = vld [vmem:[%s2410_s2 + $0x50] sm:$0xff] }
 0x1da   :  { %375 = vst.msk [vmem:[#allocation4 + $0x18] sm:$0xff] %vm195_vm2, %v1916_v57 }
 0x1db   :  { %v301_v60 = vpop.f32.mrf.mxu2 }
 0x1dc   :  { %v310_v62 = vadd.f32 %v1811_v13, %v301_v60 }
 0x1de   :  { %v364_v63 = vadd.f32 %v355_v61, %v310_v62 }
 0x1e0   :  { %v1928_v0 = vmul.f32 0.33333334, %v364_v63 }
 0x1e2   :  { %376 = vst.msk [vmem:[#allocation4 + $0x20] sm:$0xff] %vm195_vm2, %v1928_v0 }
 0x1e3   :  { %v304_v2 = vpop.f32.mrf.mxu2 }
 0x1e4   :  { %v311_v3 = vadd.f32 %v1806_v12, %v304_v2  ;;  %325 = vmatpush.msra.mxu1 %v304_v2  ;;  %v1572_v2 = vld [vmem:[%s2409_s1 + $0x30] sm:$0xff] }
 0x1e6   :  { %v365_v5 = vadd.f32 %v358_v4, %v311_v3  ;;  %326 = vmatpush.msra.mxu1 %v301_v60 }
 0x1e8   :  { %v1934_v6 = vmul.f32 0.33333334, %v365_v5  ;;  %327 = vmatpush.msra.mxu1 %v298_v54 }
 0x1e9   :  { %1531 = vmatmul.msk.f32.vlgmr.msra.gmra.mxu1 %vm33_vm0, %v1791_v9  ;;  %v1955_v9 = vld [vmem:[%s2410_s2 + $0x30] sm:$0xff] }
 0x1ea   :  { %377 = vst.msk [vmem:[#allocation4 + $0x28] sm:$0xff] %vm195_vm2, %v1934_v6  ;;  %470 = vmatpush.msrb.mxu1 %v1863_v38  ;;  %584 = vmatpush.msrb.mxu0 %v1955_v9 }
 0x1eb   :  { %1560 = vmatmul.msk.f32.vlgmr.msrb.gmra.mxu0 %vm33_vm0, %v1909_v52 }
 0x1ec   :  { %471 = vmatpush.msrb.mxu1 %v1872_v40 }
 0x1f1   :  { %1532 = vmatmul.msk.f32.gmra.mxu1 %vm33_vm0, %v1800_v11 }
 0x1f3   :  { %1561 = vmatmul.msk.f32.gmra.mxu0 %vm33_vm0, %v1921_v58 }
 0x1f9   :  { %1545 = vmatmul.msk.f32.vlgmr.msrb.gmra.mxu1 %vm95_vm1, %v431_v53  ;;  %v610_v53 = vpop.trf.xlu0 }
 0x201   :  { %1546 = vmatmul.msk.f32.gmra.mxu1 %vm95_vm1, %v432_v59  ;;  %v482_v59 = vadd.f32 %v1872_v40, %v1898_v46 }
 0x209   :  { %1547 = vmatmul.msk.f32.gmra.mxu1 %vm95_vm1, %v433_v1 }
 0x266   :  { %v329_v15 = vpop.f32.mrf.mxu1 }
 0x267   :  { %v361_v16 = vadd.f32 %v329_v15, %v307_v10 }
 0x268   :  { %v586_v23 = vpop.f32.mrf.mxu0 }
 0x269   :  { %v1971_v17 = vmul.f32 0.33333334, %v361_v16  ;;  %v1980_v24 = vadd.f32 %v1555_v22, %v586_v23 }
 0x26b   :  { %372 = vst.msk [vmem:[#allocation2 + $0x10] sm:$0xff] %vm195_vm2, %v1971_v17 }
 0x26e   :  { %v332_v11 = vpop.f32.mrf.mxu1 }
 0x26f   :  { %v362_v21 = vadd.f32 %v332_v11, %v308_v20  ;;  %v785_v20 = vpop.trf.xlu1 }
 0x270   :  { %v1993_v30 = vpop.f32.mrf.mxu0 }
 0x271   :  { %v1982_v18 = vmul.f32 0.33333334, %v362_v21  ;;  %701 = vmatpush.msra.mxu0 %v1993_v30 }
 0x273   :  { %373 = vst.msk [vmem:[#allocation2 + $0x18] sm:$0xff] %vm195_vm2, %v1982_v18  ;;  %702 = vmatpush.msra.mxu0 %v586_v23 }
 0x274   :  { %1567 = vmatmul.msk.f32.vlgmr.msra.gmra.mxu0 %vm95_vm1, %v608_v28 }
 0x276   :  { %v473_v27 = vpop.f32.mrf.mxu1 }
 0x277   :  { %v484_v29 = vadd.f32 %v1817_v14, %v473_v27 }
 0x279   :  { %v538_v33 = vadd.f32 %v527_v26, %v484_v29 }
 0x27b   :  { %v543_v34 = vmul.f32 0.33333334, %v538_v33 }
 0x27c   :  { %1568 = vmatmul.msk.f32.gmra.mxu0 %vm95_vm1, %v609_v37 }
 0x27d   :  { %550 = vst.msk [vmem:[#allocation4 + $0x30] sm:$0xff] %vm195_vm2, %v543_v34  ;;  %v1138_v62 = vadd.f32 %v543_v34, %v1916_v57 }
 0x27e   :  { %v476_v14 = vpop.f32.mrf.mxu1 }
 0x27f   :  { %v485_v42 = vadd.f32 %v1811_v13, %v476_v14  ;;  %v1141_v4 = vmul.f32 0.5, %v1138_v62 }
 0x281   :  { %v539_v43 = vadd.f32 %v530_v35, %v485_v42 }
 0x283   :  { %v544_v45 = vmul.f32 0.33333334, %v539_v43 }
 0x284   :  { %1569 = vmatmul.msk.f32.gmra.mxu0 %vm95_vm1, %v610_v53 }
 0x285   :  { %551 = vst.msk [vmem:[#allocation4 + $0x38] sm:$0xff] %vm195_vm2, %v544_v45  ;;  %v1139_v15 = vadd.f32 %v544_v45, %v1928_v0 }
 0x286   :  { %v479_v47 = vpop.f32.mrf.mxu1 }
 0x287   :  { %v486_v50 = vadd.f32 %v1806_v12, %v479_v47  ;;  %500 = vmatpush.msrb.mxu2 %v479_v47  ;;  %v2021_v12 = vld [vmem:[%s2410_s2 + $0x58] sm:$0xff]  ;;  %v1142_v11 = vmul.f32 0.5, %v1139_v15  ;;  %v955_v15 = vld [vmem:[%s2411_s3 + $0x60] sm:$0xff] }
 0x288   :  { %759 = vmatpush.msrb.mxu3 %v2021_v12 }
 0x289   :  { %v540_v54 = vadd.f32 %v533_v48, %v486_v50  ;;  %501 = vmatpush.msrb.mxu2 %v476_v14  ;;  %v660_v48 = vadd.f32 %v2011_v55, %v1993_v30 }
 0x28a   :  { %760 = vmatpush.msrb.mxu3 %v2026_v56 }
 0x28b   :  { %v2013_v13 = vmul.f32 0.33333334, %v540_v54  ;;  %502 = vmatpush.msrb.mxu2 %v473_v27 }
 0x28c   :  { %1548 = vmatmul.msk.f32.vlgmr.msrb.gmra.mxu2 %vm33_vm0, %v1851_v32  ;;  %v2035_v32 = vld [vmem:[%s2410_s2 + $0x48] sm:$0xff] }
 0x28d   :  { %552 = vst.msk [vmem:[#allocation4 + $0x40] sm:$0xff] %vm195_vm2, %v2013_v13  ;;  %647 = vmatpush.msra.mxu2 %v2011_v55  ;;  %761 = vmatpush.msrb.mxu3 %v2035_v32 }
 0x28e   :  { %1577 = vmatmul.msk.f32.vlgmr.msrb.gmra.mxu3 %vm33_vm0, %v1989_v19 }
 0x28f   :  { %648 = vmatpush.msra.mxu2 %v1555_v22 }
 0x294   :  { %1549 = vmatmul.msk.f32.gmra.mxu2 %vm33_vm0, %v1877_v41  ;;  %v483_v41 = vadd.f32 %v1863_v38, %v1904_v51 }
 0x296   :  { %1578 = vmatmul.msk.f32.gmra.mxu3 %vm33_vm0, %v2000_v36 }
 0x29c   :  { %1562 = vmatmul.msk.f32.vlgmr.msra.gmra.mxu2 %vm95_vm1, %v608_v28 }
 0x2a4   :  { %1563 = vmatmul.msk.f32.gmra.mxu2 %vm95_vm1, %v609_v37 }
 0x2ac   :  { %1564 = vmatmul.msk.f32.gmra.mxu2 %vm95_vm1, %v610_v53 }
 0x2f1   :  { %v704_v51 = vpop.f32.mrf.mxu0 }
 0x2f9   :  { %v707_v28 = vpop.f32.mrf.mxu0 }
 0x301   :  { %v710_v42 = vpop.f32.mrf.mxu0 }
 0x30f   :  { %v504_v60 = vpop.f32.mrf.mxu2 }
 0x310   :  { %v536_v61 = vadd.f32 %v504_v60, %v482_v59 }
 0x311   :  { %v763_v3 = vpop.f32.mrf.mxu3 }
 0x312   :  { %v541_v63 = vmul.f32 0.33333334, %v536_v61  ;;  %v2058_v40 = vadd.f32 %v1572_v2, %v763_v3 }
 0x314   :  { %547 = vst.msk [vmem:[#allocation2 + $0x20] sm:$0xff] %vm195_vm2, %v541_v63  ;;  %v907_v1 = vadd.f32 %v541_v63, %v1971_v17 }
 0x316   :  { %v909_v5 = vmul.f32 0.5, %v907_v1 }
 0x317   :  { %v507_v46 = vpop.f32.mrf.mxu2 }
 0x318   :  { %v537_v10 = vadd.f32 %v507_v46, %v483_v41  ;;  %v1595_v57 = vpack.i.bf16 %v909_v5, %v1141_v4 }
 0x319   :  { %v2064_v17 = vpop.f32.mrf.mxu3 }
 0x31a   :  { %v542_v16 = vmul.f32 0.33333334, %v537_v10  ;;  %1596 = vrot.lane.b32.xlu2 %v1595_v57, %s1697_s17  ;;  %878 = vmatpush.msra.mxu3 %v2064_v17  ;;  %v957_v10 = vld [vmem:[%s2411_s3 + $0x70] sm:$0xff]  ;;  %v1202_v57 = vld [vmem:[%s2412_s4 + $0x68] sm:$0xff] }
 0x31c   :  { %548 = vst.msk [vmem:[#allocation2 + $0x28] sm:$0xff] %vm195_vm2, %v542_v16  ;;  %v908_v38 = vadd.f32 %v542_v16, %v1982_v18  ;;  %879 = vmatpush.msra.mxu3 %v763_v3  ;;  %v786_v18 = vpop.trf.xlu1  ;;  %v1201_v16 = vld [vmem:[%s2412_s4 + $0x60] sm:$0xff] }
 0x31d   :  { %1584 = vmatmul.msk.f32.vlgmr.msra.gmra.mxu3 %vm95_vm1, %v785_v20 }
 0x31e   :  { %v910_v21 = vmul.f32 0.5, %v908_v38  ;;  %v954_v38 = vld [vmem:[%s2411_s3 + $0x58] sm:$0xff] }
 0x31f   :  { %v650_v22 = vpop.f32.mrf.mxu2 }
 0x320   :  { %v661_v23 = vadd.f32 %v1955_v9, %v650_v22  ;;  %v1605_v0 = vpack.i.bf16 %v910_v21, %v1142_v11  ;;  %v1199_v11 = vld [vmem:[%s2412_s4 + $0x50] sm:$0xff] }
 0x322   :  { %v715_v26 = vadd.f32 %v704_v51, %v661_v23  ;;  %1606 = vrot.lane.b32.xlu2 %v1605_v0, %s1697_s17  ;;  %v1200_v51 = vld [vmem:[%s2412_s4 + $0x58] sm:$0xff] }
 0x324   :  { %v720_v27 = vmul.f32 0.33333334, %v715_v26  ;;  %v787_v9 = vpop.trf.xlu1 }
 0x325   :  { %1585 = vmatmul.msk.f32.gmra.mxu3 %vm95_vm1, %v786_v18 }
 0x326   :  { %727 = vst.msk [vmem:[#allocation4 + $0x48] sm:$0xff] %vm195_vm2, %v720_v27 }
 0x327   :  { %v653_v29 = vpop.f32.mrf.mxu2 }
 0x328   :  { %v662_v33 = vadd.f32 %v1946_v8, %v653_v29  ;;  %v2079_v8 = vld [vmem:[%s2409_s1 + $0x38] sm:$0xff]  ;;  %s1699_s1 = smov 96  }
 0x329   :  { %v837_v26 = vadd.f32 %v2079_v8, %v2064_v17  ;;  %v951_v17 = vld [vmem:[%s2411_s3 + $0x40] sm:$0xff] }
 0x32a   :  { %v716_v34 = vadd.f32 %v707_v28, %v662_v33  ;;  %v1198_v33 = vld [vmem:[%s2412_s4 + $0x48] sm:$0xff] }
 0x32c   :  { %v721_v35 = vmul.f32 0.33333334, %v716_v34  ;;  %v1197_v34 = vld [vmem:[%s2412_s4 + $0x40] sm:$0xff] }
 0x32d   :  { %1586 = vmatmul.msk.f32.gmra.mxu3 %vm95_vm1, %v787_v9 }
 0x32e   :  { %728 = vst.msk [vmem:[#allocation4 + $0x50] sm:$0xff] %vm195_vm2, %v721_v35 }
 0x32f   :  { %v656_v14 = vpop.f32.mrf.mxu2 }
 0x330   :  { %v663_v37 = vadd.f32 %v1941_v7, %v656_v14  ;;  %677 = vmatpush.msra.mxu1 %v656_v14  ;;  %v949_v14 = vld [vmem:[%s2411_s3 + $0x30] sm:$0xff] }
 0x332   :  { %v717_v43 = vadd.f32 %v710_v42, %v663_v37  ;;  %678 = vmatpush.msra.mxu1 %v653_v29  ;;  %v1195_v37 = vld [vmem:[%s2412_s4 + $0x30] sm:$0xff]  ;;  %v948_v42 = vld [vmem:[%s2411_s3 + $0x28] sm:$0xff] }
 0x334   :  { %679 = vmatpush.msra.mxu1 %v650_v22  ;;  %v722_v45 = vmul.f32 0.33333334, %v717_v43  ;;  %v1194_v43 = vld [vmem:[%s2412_s4 + $0x28] sm:$0xff] }
 0x335   :  { %1565 = vmatmul.msk.f32.vlgmr.msra.gmra.mxu1 %vm33_vm0, %v1909_v52 }
 0x336   :  { %1163 = vrot.lane.b32.xlu1 %v722_v45, %s1698_s20  ;;  %729 = vst.msk [vmem:[#allocation4 + $0x58] sm:$0xff] %vm195_vm2, %v722_v45  ;;  %824 = vmatpush.msrb.mxu1 %v2079_v8  ;;  %v947_v8 = vld [vmem:[%s2411_s3 + $0x20] sm:$0xff] }
 0x337   :  { %v1193_v45 = vld [vmem:[%s2412_s4 + $0x20] sm:$0xff] }
 0x338   :  { %825 = vmatpush.msrb.mxu1 %v1572_v2 }
 0x33d   :  { %1566 = vmatmul.msk.f32.gmra.mxu1 %vm33_vm0, %v1921_v58 }
 0x345   :  { %1579 = vmatmul.msk.f32.vlgmr.msrb.gmra.mxu1 %vm95_vm1, %v785_v20  ;;  %v953_v20 = vld [vmem:[%s2411_s3 + $0x50] sm:$0xff] }
 0x34d   :  { %1580 = vmatmul.msk.f32.gmra.mxu1 %vm95_vm1, %v786_v18 }
 0x355   :  { %1581 = vmatmul.msk.f32.gmra.mxu1 %vm95_vm1, %v787_v9  ;;  %v1196_v9 = vld [vmem:[%s2412_s4 + $0x38] sm:$0xff] }
 0x3a0   :  { %v881_v59 = vpop.f32.mrf.mxu3 }
 0x3a8   :  { %v884_v41 = vpop.f32.mrf.mxu3 }
 0x3b2   :  { %v681_v7 = vpop.f32.mrf.mxu1 }
 0x3b3   :  { %v713_v52 = vadd.f32 %v681_v7, %v1980_v24  ;;  %v1140_v24 = vadd.f32 %v2013_v13, %v1934_v6  ;;  %v887_v13 = vpop.f32.mrf.mxu3  ;;  %v946_v7 = vld [vmem:[%s2411_s3 + $0x18] sm:$0xff] }
 0x3b5   :  { %v718_v47 = vmul.f32 0.33333334, %v713_v52  ;;  %v1143_v62 = vmul.f32 0.5, %v1140_v24  ;;  %v1192_v52 = vld [vmem:[%s2412_s4 + $0x18] sm:$0xff] }
 0x3b7   :  { %724 = vst.msk [vmem:[#allocation2 + $0x30] sm:$0xff] %vm195_vm2, %v718_v47  ;;  %v1600_v50 = vpack.i.bf16 %v718_v47, %v720_v27  ;;  %v945_v47 = vld [vmem:[%s2411_s3 + $0x10] sm:$0xff] }
 0x3b9   :  { %1601 = vrot.lane.b32.xlu0 %v1600_v50, %s1698_s20  ;;  %v1597_v50 = vpop.permute.xlu2 %1596 }
 0x3ba   :  { %v684_v53 = vpop.f32.mrf.mxu1 }
 0x3bb   :  { %v714_v58 = vadd.f32 %v684_v53, %v660_v48  ;;  %v1191_v48 = vld [vmem:[%s2412_s4 + $0x10] sm:$0xff]  ;;  %v944_v53 = vld [vmem:[%s2411_s3 + $0x8] sm:$0xff] }
 0x3bd   :  { %v719_v54 = vmul.f32 0.33333334, %v714_v58  ;;  %v1190_v58 = vld [vmem:[%s2412_s4 + $0x8] sm:$0xff] }
 0x3bf   :  { %v1610_v60 = vpack.i.bf16 %v719_v54, %v721_v35  ;;  %725 = vst.msk [vmem:[#allocation2 + $0x38] sm:$0xff] %vm195_vm2, %v719_v54  ;;  %v950_v35 = vld [vmem:[%s2411_s3 + $0x38] sm:$0xff]  ;;  %v943_v54 = vld [vmem:[%s2411_s3] sm:$0xff] }
 0x3c1   :  { %1611 = vrot.lane.b32.xlu2 %v1610_v60, %s1698_s20  ;;  %v1607_v60 = vpop.permute.xlu2 %1606 }
 0x3c2   :  { %v827_v61 = vpop.f32.mrf.mxu1 }
 0x3c3   :  { %v838_v30 = vadd.f32 %v2035_v32, %v827_v61 }
 0x3c5   :  { %v892_v55 = vadd.f32 %v881_v59, %v838_v30  ;;  %v1189_v59 = vld [vmem:[%s2412_s4] sm:$0xff] }
 0x3c7   :  { %v897_v63 = vmul.f32 0.33333334, %v892_v55 }
 0x3c9   :  { %904 = vst.msk [vmem:[#allocation4 + $0x60] sm:$0xff] %vm195_vm2, %v897_v63  ;;  %1151 = vrot.lane.b32.xlu2 %v1143_v62, %s1697_s17  ;;  %v1599_v62 = vunpack.i.h.bf16 %v1597_v50 }
 0x3ca   :  { %v830_v1 = vpop.f32.mrf.mxu1 }
 0x3cb   :  { %v839_v2 = vadd.f32 %v2026_v56, %v830_v1  ;;  %v958_v56 = vld [vmem:[%s2411_s3 + $0x78] sm:$0xff] }
 0x3cc   :  { %959 = vmatpush.msrb.mxu0 %v958_v56 }
 0x3cd   :  { %v893_v3 = vadd.f32 %v884_v41, %v839_v2  ;;  %v1598_v41 = vunpack.i.l.bf16 %v1597_v50 }
 0x3ce   :  { %960 = vmatpush.msrb.mxu0 %v957_v10 }
 0x3cf   :  { %v898_v4 = vmul.f32 0.33333334, %v893_v3  ;;  %v935_v3 = vsel %vm195_vm2, %v1892_v44, %v1599_v62  ;;  %v1609_v44 = vunpack.i.h.bf16 %v1607_v60 }
 0x3d1   :  { %905 = vst.msk [vmem:[#allocation4 + $0x68] sm:$0xff] %vm195_vm2, %v898_v4  ;;  %1173 = vrot.lane.b32.xlu1 %v898_v4, %s1699_s1 }
 0x3d2   :  { %v833_v6 = vpop.f32.mrf.mxu1 }
 0x3d3   :  { %v840_v32 = vadd.f32 %v2021_v12, %v833_v6  ;;  %854 = vmatpush.msrb.mxu2 %v833_v6  ;;  %v1204_v12 = vld [vmem:[%s2412_s4 + $0x78] sm:$0xff]  ;;  %v1180_v6 = vsel %vm195_vm2, %v1841_v25, %v1598_v41 }
 0x3d4   :  { %1205 = vmatpush.msra.mxu1 %v1204_v12 }
 0x3d5   :  { %v894_v5 = vadd.f32 %v887_v13, %v840_v32  ;;  %855 = vmatpush.msrb.mxu2 %v830_v1 }
 0x3d7   :  { %v899_v46 = vmul.f32 0.33333334, %v894_v5  ;;  %856 = vmatpush.msrb.mxu2 %v827_v61  ;;  %v1164_v61 = vpop.permute.xlu1 %1163 }
 0x3d8   :  { %1582 = vmatmul.msk.f32.vlgmr.msrb.gmra.mxu2 %vm33_vm0, %v1989_v19  ;;  %v1203_v19 = vld [vmem:[%s2412_s4 + $0x70] sm:$0xff] }
 0x3d9   :  { %906 = vst.msk [vmem:[#allocation4 + $0x70] sm:$0xff] %vm195_vm2, %v899_v46  ;;  %1206 = vmatpush.msra.mxu1 %v1203_v19  ;;  %v1608_v19 = vunpack.i.l.bf16 %v1607_v60 }
 0x3da   :  { %1490 = dma.vmem_to_hbm [thread:$0]  %s1483_s21, 1920, %s1485_s24, [#allocation5], %s1702_s25, %s1702_s25, %s1703_s26  }
 0x3db   :  { %1207 = vmatpush.msra.mxu1 %v1202_v57 }
 0x3dd   :  { %1208 = vmatpush.msra.mxu1 %v1201_v16  ;;  %v1181_v16 = vsel %vm195_vm2, %v1846_v31, %v1608_v19 }
 0x3df   :  { %1209 = vmatpush.msra.mxu1 %v1200_v51 }
 0x3e0   :  { %1583 = vmatmul.msk.f32.gmra.mxu2 %vm33_vm0, %v2000_v36  ;;  %v956_v36 = vld [vmem:[%s2411_s3 + $0x68] sm:$0xff] }
 0x3e1   :  { %961 = vmatpush.msrb.mxu0 %v956_v36  ;;  %1210 = vmatpush.msra.mxu1 %v1199_v11 }
 0x3e3   :  { %962 = vmatpush.msrb.mxu0 %v955_v15  ;;  %1211 = vmatpush.msra.mxu1 %v1198_v33  ;;  %v936_v15 = vsel %vm195_vm2, %v1900_v49, %v1609_v44 }
 0x3e5   :  { %963 = vmatpush.msrb.mxu0 %v954_v38  ;;  %1212 = vmatpush.msra.mxu1 %v1197_v34 }
 0x3e7   :  { %964 = vmatpush.msrb.mxu0 %v953_v20  ;;  %1213 = vmatpush.msra.mxu1 %v1196_v9 }
 0x3e9   :  { %1214 = vmatpush.msra.mxu1 %v1195_v37 }
 0x3eb   :  { %1215 = vmatpush.msra.mxu1 %v1194_v43 }
 0x3ed   :  { %1216 = vmatpush.msra.mxu1 %v1193_v45 }
 0x3ef   :  { %1217 = vmatpush.msra.mxu1 %v1192_v52 }
 0x3f1   :  { %1218 = vmatpush.msra.mxu1 %v1191_v48 }
 0x3f3   :  { %1219 = vmatpush.msra.mxu1 %v1190_v58 }
 0x3f5   :  { %1220 = vmatpush.msra.mxu1 %v1189_v59 }
 0x41b   :  { %v1612_v24 = vpop.permute.xlu2 %1611 }
 0x41c   :  { %v1614_v36 = vunpack.i.h.bf16 %v1612_v24  ;;  %v1613_v57 = vunpack.i.l.bf16 %v1612_v24 }
 0x41e   :  { %v939_v38 = vsel %vm937_vm3, %v936_v15, %v1614_v36  ;;  %v1184_v51 = vsel %vm937_vm3, %v1181_v16, %v1613_v57 }
 0x42b   :  { %v1602_v55 = vpop.permute.xlu0 %1601 }
 0x42c   :  { %v1604_v1 = vunpack.i.h.bf16 %v1602_v55  ;;  %v1603_v2 = vunpack.i.l.bf16 %v1602_v55 }
 0x42e   :  { %v938_v5 = vsel %vm937_vm3, %v935_v3, %v1604_v1 }
 0x443   :  { %v1174_v30 = vpop.permute.xlu1 %1173 }
 0x444   :  { %v1187_v11 = vsel %vm940_vm4, %v1184_v51, %v1174_v30 }
 0x45b   :  { %v858_v21 = vpop.f32.mrf.mxu2 }
 0x45c   :  { %v890_v22 = vadd.f32 %v858_v21, %v2058_v40  ;;  %v952_v40 = vld [vmem:[%s2411_s3 + $0x48] sm:$0xff]  ;;  %s1700_s3 = smov [#allocation2]  }
 0x45d   :  { %965 = vmatpush.msrb.mxu0 %v952_v40  ;;  %s1469_s4 = sshll.u32 %s1700_s3, 4  ;;  %s1470_s4 = int_to_ptr.vmem [resolvable:$true] %s1469_s4 }
 0x45e   :  { %v895_v23 = vmul.f32 0.33333334, %v890_v22 }
 0x45f   :  { %966 = vmatpush.msrb.mxu0 %v951_v17 }
 0x460   :  { %901 = vst.msk [vmem:[#allocation2 + $0x40] sm:$0xff] %vm195_vm2, %v895_v23  ;;  %v1615_v0 = vpack.i.bf16 %v895_v23, %v897_v63  ;;  %v1152_v63 = vpop.permute.xlu2 %1151 }
 0x461   :  { %967 = vmatpush.msrb.mxu0 %v950_v35  ;;  %v1182_v21 = vsel %vm195_vm2, %v1865_v39, %v1152_v63 }
 0x462   :  { %1616 = vrot.lane.b32.xlu1 %v1615_v0, %s1699_s1  ;;  %v1185_v23 = vsel %vm937_vm3, %v1182_v21, %v1164_v61 }
 0x463   :  { %v861_v27 = vpop.f32.mrf.mxu2  ;;  %968 = vmatpush.msrb.mxu0 %v949_v14 }
 0x464   :  { %v891_v18 = vadd.f32 %v861_v27, %v837_v26 }
 0x465   :  { %969 = vmatpush.msrb.mxu0 %v948_v42 }
 0x466   :  { %v896_v28 = vmul.f32 0.33333334, %v891_v18 }
 0x467   :  { %970 = vmatpush.msrb.mxu0 %v947_v8 }
 0x468   :  { %v1620_v29 = vpack.i.bf16 %v899_v46, %v896_v28  ;;  %902 = vst.msk [vmem:[#allocation2 + $0x48] sm:$0xff] %vm195_vm2, %v896_v28  ;;  %v1183_v46 = vsel %vm937_vm3, %v1180_v6, %v1603_v2 }
 0x469   :  { %971 = vmatpush.msrb.mxu0 %v946_v7  ;;  %1477 = dma.vmem_to_hbm [thread:$0]  %s1470_s4, 1280, %s1472_s18, [#allocation3], %s1702_s25, %s1702_s25, %s1703_s26  }
 0x46a   :  { %1621 = vrot.lane.b32.xlu2 %v1620_v29, %s1699_s1 }
 0x46b   :  { %972 = vmatpush.msrb.mxu0 %v945_v47 }
 0x46d   :  { %973 = vmatpush.msrb.mxu0 %v944_v53 }
 0x46f   :  { %974 = vmatpush.msrb.mxu0 %v943_v54 }
 0x4c4   :  { %v1622_v10 = vpop.permute.xlu2 %1621 }
 0x4c5   :  { %v1623_v25 = vunpack.i.l.bf16 %v1622_v10  ;;  %v1624_v22 = vunpack.i.h.bf16 %v1622_v10 }
 0x4c7   :  { %v942_v20 = vsel %vm940_vm4, %v939_v38, %v1623_v25  ;;  %v1188_v49 = vsel %vm940_vm4, %v1185_v23, %v1624_v22 }
 0x4d4   :  { %v1617_v4 = vpop.permute.xlu1 %1616 }
 0x4d5   :  { %v1619_v13 = vunpack.i.h.bf16 %v1617_v4  ;;  %v1618_v32 = vunpack.i.l.bf16 %v1617_v4 }
 0x4d7   :  { %v941_v56 = vsel %vm940_vm4, %v938_v5, %v1619_v13  ;;  %v1186_v12 = vsel %vm940_vm4, %v1183_v46, %v1618_v32 }
 0x4d8   :  { %975 = vmatmul.f32.vlgmr.msrb.gmra.mxu0 %v941_v56  ;;  %1221 = vmatmul.f32.vlgmr.msra.gmra.mxu1 %v1186_v12 }
 0x4e0   :  { %978 = vmatmul.f32.gmra.mxu0 %v942_v20  ;;  %1224 = vmatmul.f32.gmra.mxu1 %v1187_v11 }
 0x4e8   :  { %1227 = vmatmul.f32.gmra.mxu1 %v1188_v49 }
 0x555   :  { %v1222_v31 = vpop.f32.mrf.mxu1  ;;  %v976_v52 = vpop.f32.mrf.mxu0 }
 0x556   :  { %v2235_v0 = vmax.f32 %v1222_v31, 0.0  ;;  %v2267_v47 = vmax.f32 %v976_v52, 0.0 }
 0x558   :  { %1237 = vrot.lane.b32.xlu0 %v2235_v0, %s1699_s1  ;;  %v1270_v26 = vmul.f32 %v2235_v0, %v2235_v0  ;;  %v1008_v48 = vmul.f32 %v2267_v47, %v2267_v47 }
 0x55a   :  { %v1378_v27 = vsel %vm195_vm2, %v1270_v26, 0.0  ;;  %v1080_v50 = vsel %vm195_vm2, %v1008_v48, 0.0 }
 0x55b   :  { %1379 = vadd.xlane.f32.xlu1 %v1378_v27 }
 0x55d   :  { %v1225_v18 = vpop.f32.mrf.mxu1  ;;  %v979_v54 = vpop.f32.mrf.mxu0 }
 0x55e   :  { %v2242_v39 = vmax.f32 %v1225_v18, 0.0  ;;  %v2276_v60 = vmax.f32 %v979_v54, 0.0 }
 0x560   :  { %1276 = vrot.lane.b32.xlu0 %v1270_v26, %s1698_s20  ;;  %1239 = vrot.lane.b32.xlu2 %v2242_v39, %s1699_s1  ;;  %v1271_v33 = vmul.f32 %v2242_v39, %v2242_v39  ;;  %v1009_v61 = vmul.f32 %v2276_v60, %v2276_v60 }
 0x562   :  { %v1381_v17 = vsel %vm195_vm2, %v1271_v33, 0.0  ;;  %v1083_v30 = vsel %vm195_vm2, %v1009_v61, 0.0 }
 0x565   :  { %v1228_v28 = vpop.f32.mrf.mxu1 }
 0x566   :  { %v2247_v29 = vmax.f32 %v1228_v28, 0.0 }
 0x568   :  { %1241 = vrot.lane.b32.xlu0 %v2247_v29, %s1699_s1  ;;  %v1272_v40 = vmul.f32 %v2247_v29, %v2247_v29 }
 0x56a   :  { %v1384_v34 = vsel %vm195_vm2, %v1272_v40, 0.0 }
 0x570   :  { %1280 = vrot.lane.b32.xlu0 %v1272_v40, %s1698_s20 }
 0x574   :  { %1278 = vrot.lane.b32.xlu1 %v1271_v33, %s1698_s20 }
 0x59e   :  { %1382 = vadd.xlane.f32.xlu1 %v1381_v17 }
 0x5a6   :  { %1385 = vadd.xlane.f32.xlu1 %v1384_v34 }
 0x5ba   :  { %v1240_v14 = vpop.permute.xlu2 %1239 }
 0x5bb   :  { %v1247_v42 = vmul.f32 %v1240_v14, %v2242_v39 }
 0x5ca   :  { %v1238_v35 = vpop.permute.xlu0 %1237 }
 0x5cb   :  { %v1246_v9 = vmul.f32 %v1238_v35, %v2235_v0 }
 0x5cd   :  { %1360 = vrot.lane.b32.xlu2 %v1246_v9, %s1697_s17  ;;  %1252 = vrot.lane.b32.xlu0 %v1246_v9, %s1699_s1 }
 0x5ce   :  { %v1380_v53 = vpop.xlane.xlu1 %1379 }
 0x5cf   :  { %v1387_v16 = vadd.f32 1e-20, %v1380_v53 }
 0x5d1   :  { %v1401_v14 = vand.u32 2147483648, %v1387_v16  ;;  %vm1395_vm10 = vweird.f32 %v1387_v16 }
 0x5d2   :  { %v1277_v37 = vpop.permute.xlu0 %1276 }
 0x5d3   :  { %v1285_v43 = vsel %vm195_vm2, %v1277_v37, 0.0 }
 0x5d4   :  { %1286 = vadd.xlane.f32.xlu1 %v1285_v43 }
 0x5d5   :  { %1254 = vrot.lane.b32.xlu0 %v1247_v42, %s1699_s1 }
 0x5da   :  { %v1242_v8 = vpop.permute.xlu0 %1241 }
 0x5db   :  { %v1248_v24 = vmul.f32 %v1242_v8, %v2247_v29  ;;  %v1402_v8 = vor.u32 1.1754944e-38, %v1401_v14 }
 0x5dd   :  { %1362 = vrot.lane.b32.xlu0 %v1247_v42, %s1697_s17  ;;  %v1399_v42 = vand.u32 2147483647, %v1387_v16 }
 0x5df   :  { %vm1400_vm12 = vcmp.eq.f32.partialorder %v1399_v42, 8.507059e+37 }
 0x5e2   :  { %v1281_v45 = vpop.permute.xlu0 %1280 }
 0x5e3   :  { %v1291_v7 = vsel %vm195_vm2, %v1281_v45, 0.0 }
 0x5e4   :  { %1292 = vadd.xlane.f32.xlu1 %v1291_v7 }
 0x5e6   :  { %v1279_v58 = vpop.permute.xlu1 %1278 }
 0x5e7   :  { %v1288_v59 = vsel %vm195_vm2, %v1279_v58, 0.0 }
 0x5f6   :  { %1081 = vadd.xlane.f32.xlu2 %v1080_v50 }
 0x5fd   :  { %986 = vrot.lane.b32.xlu1 %v2267_v47, %s1699_s1 }
 0x605   :  { %1012 = vrot.lane.b32.xlu1 %v1008_v48, %s1698_s20 }
 0x607   :  { %1289 = vadd.xlane.f32.xlu0 %v1288_v59 }
 0x60d   :  { %1014 = vrot.lane.b32.xlu1 %v1009_v61, %s1698_s20 }
 0x611   :  { %v2288_v41 = vpop.xlane.xlu1 %1382 }
 0x619   :  { %v2291_v2 = vpop.xlane.xlu1 %1385 }
 0x61b   :  { %1256 = vrot.lane.b32.xlu0 %v1248_v24, %s1699_s1 }
 0x623   :  { %1364 = vrot.lane.b32.xlu0 %v1248_v24, %s1697_s17 }
 0x627   :  { %v1361_v3 = vpop.permute.xlu2 %1360 }
 0x628   :  { %v1369_v4 = vsel %vm195_vm2, %v1361_v3, 0.0 }
 0x62b   :  { %988 = vrot.lane.b32.xlu0 %v2276_v60, %s1699_s1 }
 0x637   :  { %1084 = vadd.xlane.f32.xlu1 %v1083_v30 }
 0x63f   :  { %v1253_v55 = vpop.permute.xlu0 %1252 }
 0x640   :  { %v1261_v1 = vsel %vm195_vm2, %v1253_v55, 0.0 }
 0x647   :  { %v1255_v62 = vpop.permute.xlu0 %1254  ;;  %v1287_v6 = vpop.xlane.xlu1 %1286 }
 0x648   :  { %v1264_v63 = vsel %vm195_vm2, %v1255_v62, 0.0  ;;  %v1294_v15 = vadd.f32 1e-20, %v1287_v6 }
 0x649   :  { %1265 = vadd.xlane.f32.xlu1 %v1264_v63 }
 0x64a   :  { %1625 = vrcp.f32 %v1294_v15  ;;  %v1308_v27 = vand.u32 2147483648, %v1294_v15  ;;  %vm1302_vm6 = vweird.f32 %v1294_v15  ;;  %v1306_v18 = vand.u32 2147483647, %v1294_v15 }
 0x64b   :  { %1627 = vrcp.f32 %v1387_v16 }
 0x64c   :  { %v1309_v33 = vor.u32 1.1754944e-38, %v1308_v27  ;;  %vm1307_vm8 = vcmp.eq.f32.partialorder %v1306_v18, 8.507059e+37 }
 0x64f   :  { %v1363_v56 = vpop.permute.xlu0 %1362 }
 0x650   :  { %v1626_v51 = vpop.eup %1625  ;;  %v1372_v54 = vsel %vm195_vm2, %v1363_v56, 0.0 }
 0x651   :  { %v1298_v11 = vmul.f32 %v1626_v51, %v1294_v15  ;;  %v1628_v22 = vpop.eup %1627  ;;  %vm1303_vm5 = vweird.f32 %v1626_v51 }
 0x652   :  { %v1391_v49 = vmul.f32 %v1628_v22, %v1387_v16  ;;  %vm1304_vm7 = vmor %vm1302_vm6, %vm1303_vm5  ;;  %vm1396_vm9 = vweird.f32 %v1628_v22 }
 0x653   :  { %v1299_v21 = vsub.f32 1.0, %v1298_v11  ;;  %vm1397_vm11 = vmor %vm1395_vm10, %vm1396_vm9 }
 0x654   :  { %v1392_v26 = vsub.f32 1.0, %v1391_v49 }
 0x655   :  { %1262 = vadd.xlane.f32.xlu0 %v1261_v1  ;;  %v1300_v23 = vmul.f32 %v1626_v51, %v1299_v21  ;;  %v1389_v21 = vadd.f32 1e-20, %v2291_v2 }
 0x656   :  { %v1393_v40 = vmul.f32 %v1628_v22, %v1392_v26 }
 0x657   :  { %v2294_v13 = vpop.xlane.xlu1 %1292  ;;  %v1301_v31 = vadd.f32 %v1626_v51, %v1300_v23  ;;  %vm1425_vm9 = vweird.f32 %v1389_v21 }
 0x658   :  { %v1394_v9 = vadd.f32 %v1628_v22, %v1393_v40  ;;  %v1296_v59 = vadd.f32 1e-20, %v2294_v13 }
 0x659   :  { %v1305_v28 = vsel %vm1304_vm7, %v1626_v51, %v1301_v31 }
 0x65a   :  { %v1310_v17 = vsel %vm1307_vm8, %v1309_v33, %v1305_v28  ;;  %v1398_v43 = vsel %vm1397_vm11, %v1628_v22, %v1394_v9  ;;  %vm1332_vm5 = vweird.f32 %v1296_v59 }
 0x65b   :  { %v1403_v7 = vsel %vm1400_vm12, %v1402_v8, %v1398_v43 }
 0x65d   :  { %1370 = vadd.xlane.f32.xlu0 %v1369_v4 }
 0x66f   :  { %v987_v32 = vpop.permute.xlu1 %986 }
 0x670   :  { %v992_v5 = vmul.f32 %v987_v32, %v2267_v47 }
 0x672   :  { %1068 = vrot.lane.b32.xlu1 %v992_v5, %s1697_s17 }
 0x677   :  { %v1013_v46 = vpop.permute.xlu1 %1012 }
 0x678   :  { %v1018_v57 = vsel %vm195_vm2, %v1013_v46, 0.0 }
 0x67a   :  { %v1290_v44 = vpop.xlane.xlu0 %1289 }
 0x67b   :  { %v1295_v48 = vadd.f32 1e-20, %v1290_v44 }
 0x67d   :  { %1629 = vrcp.f32 %v1295_v48  ;;  %v1323_v62 = vand.u32 2147483648, %v1295_v48  ;;  %vm1317_vm14 = vweird.f32 %v1295_v48  ;;  %v1321_v1 = vand.u32 2147483647, %v1295_v48 }
 0x67e   :  { %1631 = vrcp.f32 %v1296_v59 }
 0x67f   :  { %v1015_v12 = vpop.permute.xlu1 %1014  ;;  %v1324_v4 = vor.u32 1.1754944e-38, %v1323_v62  ;;  %vm1322_vm0 = vcmp.eq.f32.partialorder %v1321_v1, 8.507059e+37  ;;  %1633 = vrcp.f32 %v1389_v21 }
 0x680   :  { %v1021_v10 = vsel %vm195_vm2, %v1015_v12, 0.0 }
 0x681   :  { %1022 = vadd.xlane.f32.xlu0 %v1021_v10  ;;  %v2316_v10 = vpop.xlane.xlu2 %1081 }
 0x683   :  { %v1630_v53 = vpop.eup %1629 }
 0x684   :  { %v1313_v58 = vmul.f32 %v1630_v53, %v1295_v48  ;;  %vm1318_vm13 = vweird.f32 %v1630_v53  ;;  %v1632_v63 = vpop.eup %1631 }
 0x685   :  { %vm1319_vm15 = vmor %vm1317_vm14, %vm1318_vm13  ;;  %v1328_v32 = vmul.f32 %v1632_v63, %v1296_v59  ;;  %vm1333_vm1 = vweird.f32 %v1632_v63  ;;  %v1634_v49 = vpop.eup %1633 }
 0x686   :  { %v1314_v61 = vsub.f32 1.0, %v1313_v58  ;;  %vm1334_vm6 = vmor %vm1332_vm5, %vm1333_vm1  ;;  %v1421_v26 = vmul.f32 %v1634_v49, %v1389_v21  ;;  %vm1426_vm8 = vweird.f32 %v1634_v49 }
 0x687   :  { %v1329_v46 = vsub.f32 1.0, %v1328_v32  ;;  %vm1427_vm10 = vmor %vm1425_vm9, %vm1426_vm8 }
 0x688   :  { %v1315_v24 = vmul.f32 %v1630_v53, %v1314_v61  ;;  %v1422_v18 = vsub.f32 1.0, %v1421_v26 }
 0x689   :  { %v1330_v12 = vmul.f32 %v1632_v63, %v1329_v46 }
 0x68a   :  { %v1316_v55 = vadd.f32 %v1630_v53, %v1315_v24  ;;  %v1423_v40 = vmul.f32 %v1634_v49, %v1422_v18 }
 0x68b   :  { %v1331_v44 = vadd.f32 %v1632_v63, %v1330_v12 }
 0x68c   :  { %v1320_v3 = vsel %vm1319_vm15, %v1630_v53, %v1316_v55  ;;  %v1424_v33 = vadd.f32 %v1634_v49, %v1423_v40 }
 0x68d   :  { %v1257_v19 = vpop.permute.xlu0 %1256  ;;  %v1325_v13 = vsel %vm1322_vm0, %v1324_v4, %v1320_v3 }
 0x68e   :  { %v1267_v36 = vsel %vm195_vm2, %v1257_v19, 0.0  ;;  %v1338_v19 = vand.u32 2147483648, %v1296_v59  ;;  %v1428_v2 = vsel %vm1427_vm10, %v1634_v49, %v1424_v33 }
 0x68f   :  { %1268 = vadd.xlane.f32.xlu2 %v1267_v36  ;;  %v1336_v36 = vand.u32 2147483647, %v1296_v59 }
 0x691   :  { %vm1337_vm7 = vcmp.eq.f32.partialorder %v1336_v36, 8.507059e+37 }
 0x695   :  { %v1365_v25 = vpop.permute.xlu0 %1364 }
 0x696   :  { %v1375_v45 = vsel %vm195_vm2, %v1365_v25, 0.0  ;;  %v1339_v25 = vor.u32 1.1754944e-38, %v1338_v19 }
 0x69c   :  { %1019 = vadd.xlane.f32.xlu1 %v1018_v57  ;;  %v1335_v57 = vsel %vm1334_vm6, %v1632_v63, %v1331_v44  ;;  %v1086_v44 = vadd.f32 1e-20, %v2316_v10 }
 0x69d   :  { %v989_v38 = vpop.permute.xlu0 %988  ;;  %v1340_v16 = vsel %vm1337_vm7, %v1339_v25, %v1335_v57 }
 0x69e   :  { %v993_v20 = vmul.f32 %v989_v38, %v2276_v60  ;;  %vm1093_vm8 = vweird.f32 %v1086_v44  ;;  %v1097_v26 = vand.u32 2147483647, %v1086_v44 }
 0x6a0   :  { %vm1098_vm10 = vcmp.eq.f32.partialorder %v1097_v26, 8.507059e+37 }
 0x6a7   :  { %996 = vrot.lane.b32.xlu2 %v992_v5, %s1699_s1 }
 0x6aa   :  { %v2311_v30 = vpop.xlane.xlu1 %1084 }
 0x6b5   :  { %998 = vrot.lane.b32.xlu1 %v993_v20, %s1699_s1 }
 0x6bc   :  { %v1266_v6 = vpop.xlane.xlu1 %1265 }
 0x6bd   :  { %v1326_v5 = vmul.f32 %v1325_v13, %v1266_v6 }
 0x6bf   :  { %v1343_v56 = vmul.f32 %v1326_v5, %v2242_v39 }
 0x6c8   :  { %v1263_v34 = vpop.xlane.xlu0 %1262 }
 0x6c9   :  { %v1311_v35 = vmul.f32 %v1310_v17, %v1263_v34  ;;  %v1431_v17 = vand.u32 2147483648, %v1389_v21  ;;  %v1429_v34 = vand.u32 2147483647, %v1389_v21 }
 0x6cb   :  { %v1342_v37 = vmul.f32 %v1311_v35, %v2235_v0  ;;  %v1432_v35 = vor.u32 1.1754944e-38, %v1431_v17  ;;  %vm1430_vm11 = vcmp.eq.f32.partialorder %v1429_v34, 8.507059e+37 }
 0x6cd   :  { %1348 = vrot.lane.b32.xlu0 %v1342_v37, %s1699_s1  ;;  %v1433_v9 = vsel %vm1430_vm11, %v1432_v35, %v1428_v2 }
 0x6d0   :  { %1376 = vadd.xlane.f32.xlu2 %v1375_v45  ;;  %v1371_v52 = vpop.xlane.xlu0 %1370  ;;  %v1388_v45 = vadd.f32 1e-20, %v2288_v41 }
 0x6d1   :  { %v2307_v50 = vmul.f32 %v1403_v7, %v1371_v52 }
 0x6d2   :  { %v1416_v6 = vand.u32 2147483648, %v1388_v45  ;;  %vm1410_vm1 = vweird.f32 %v1388_v45  ;;  %v1414_v5 = vand.u32 2147483647, %v1388_v45 }
 0x6d4   :  { %v1417_v19 = vor.u32 1.1754944e-38, %v1416_v6  ;;  %vm1415_vm6 = vcmp.eq.f32.partialorder %v1414_v5, 8.507059e+37 }
 0x6df   :  { %1373 = vadd.xlane.f32.xlu1 %v1372_v54 }
 0x6e4   :  { %v1069_v22 = vpop.permute.xlu1 %1068 }
 0x6e5   :  { %v1074_v31 = vsel %vm195_vm2, %v1069_v22, 0.0 }
 0x6e8   :  { %1070 = vrot.lane.b32.xlu2 %v993_v20, %s1697_s17 }
 0x6f4   :  { %v1023_v53 = vpop.xlane.xlu0 %1022 }
 0x6f8   :  { %1350 = vrot.lane.b32.xlu1 %v1343_v56, %s1699_s1 }
 0x702   :  { %v1269_v15 = vpop.xlane.xlu2 %1268 }
 0x703   :  { %v1341_v38 = vmul.f32 %v1340_v16, %v1269_v15  ;;  %v1025_v16 = vadd.f32 1e-20, %v1023_v53 }
 0x705   :  { %v1344_v51 = vmul.f32 %v1341_v38, %v2247_v29  ;;  %v1052_v35 = vand.u32 2147483648, %v1025_v16 }
 0x707   :  { %1352 = vrot.lane.b32.xlu2 %v1344_v51, %s1699_s1 }
 0x70a   :  { %v997_v20 = vpop.permute.xlu2 %996 }
 0x70b   :  { %v1002_v11 = vsel %vm195_vm2, %v997_v20, 0.0 }
 0x70c   :  { %1003 = vadd.xlane.f32.xlu0 %v1002_v11 }
 0x70f   :  { %v1020_v23 = vpop.xlane.xlu1 %1019 }
 0x710   :  { %v1024_v8 = vadd.f32 1e-20, %v1020_v23 }
 0x712   :  { %1635 = vrcp.f32 %v1024_v8  ;;  %v1037_v62 = vand.u32 2147483648, %v1024_v8  ;;  %vm1031_vm13 = vweird.f32 %v1024_v8  ;;  %v1035_v1 = vand.u32 2147483647, %v1024_v8 }
 0x713   :  { %1637 = vrcp.f32 %v1388_v45 }
 0x714   :  { %v1038_v41 = vor.u32 1.1754944e-38, %v1037_v62  ;;  %vm1036_vm0 = vcmp.eq.f32.partialorder %v1035_v1, 8.507059e+37  ;;  %1639 = vrcp.f32 %v1086_v44 }
 0x715   :  { %1641 = vrcp.f32 %v1025_v16 }
 0x718   :  { %v1636_v7 = vpop.eup %1635 }
 0x719   :  { %v1027_v52 = vmul.f32 %v1636_v7, %v1024_v8  ;;  %v1638_v48 = vpop.eup %1637  ;;  %vm1032_vm12 = vweird.f32 %v1636_v7 }
 0x71a   :  { %v1406_v54 = vmul.f32 %v1638_v48, %v1388_v45  ;;  %vm1033_vm14 = vmor %vm1031_vm13, %vm1032_vm12  ;;  %vm1411_vm15 = vweird.f32 %v1638_v48  ;;  %v1640_v38 = vpop.eup %1639  ;;  %vm1046_vm12 = vweird.f32 %v1025_v16 }
 0x71b   :  { %v1028_v58 = vsub.f32 1.0, %v1027_v52  ;;  %vm1412_vm5 = vmor %vm1410_vm1, %vm1411_vm15  ;;  %v1089_v51 = vmul.f32 %v1640_v38, %v1086_v44  ;;  %v1642_v11 = vpop.eup %1641  ;;  %vm1094_vm7 = vweird.f32 %v1640_v38 }
 0x71c   :  { %v1407_v61 = vsub.f32 1.0, %v1406_v54  ;;  %v1042_v10 = vmul.f32 %v1642_v11, %v1025_v16  ;;  %vm1095_vm9 = vmor %vm1093_vm8, %vm1094_vm7  ;;  %vm1047_vm11 = vweird.f32 %v1642_v11  ;;  %v1435_v54 = vmul.f32 %v2307_v50, %v2235_v0 }
 0x71d   :  { %v1029_v59 = vmul.f32 %v1636_v7, %v1028_v58  ;;  %v1090_v20 = vsub.f32 1.0, %v1089_v51  ;;  %vm1048_vm13 = vmor %vm1046_vm12, %vm1047_vm11 }
 0x71e   :  { %v1408_v63 = vmul.f32 %v1638_v48, %v1407_v61  ;;  %v1043_v49 = vsub.f32 1.0, %v1042_v10 }
 0x71f   :  { %v1030_v55 = vadd.f32 %v1636_v7, %v1029_v59  ;;  %v1091_v21 = vmul.f32 %v1640_v38, %v1090_v20 }
 0x720   :  { %v1409_v4 = vadd.f32 %v1638_v48, %v1408_v63 }
 0x721   :  { %v1034_v3 = vsel %vm1033_vm14, %v1636_v7, %v1030_v55  ;;  %v1092_v23 = vadd.f32 %v1640_v38, %v1091_v21 }
 0x722   :  { %v1039_v13 = vsel %vm1036_vm0, %v1038_v41, %v1034_v3  ;;  %v1413_v56 = vsel %vm1412_vm5, %v1638_v48, %v1409_v4 }
 0x723   :  { %v1418_v57 = vsel %vm1415_vm6, %v1417_v19, %v1413_v56  ;;  %v1096_v18 = vsel %vm1095_vm9, %v1640_v38, %v1092_v23 }
 0x727   :  { %v999_v27 = vpop.permute.xlu1 %998 }
 0x728   :  { %v1005_v28 = vsel %vm195_vm2, %v999_v27, 0.0  ;;  %v1087_v27 = vadd.f32 1e-20, %v2311_v30  ;;  %v1053_v30 = vor.u32 1.1754944e-38, %v1052_v35 }
 0x72a   :  { %1643 = vrcp.f32 %v1087_v27  ;;  %v1114_v55 = vand.u32 2147483648, %v1087_v27  ;;  %vm1108_vm0 = vweird.f32 %v1087_v27  ;;  %v1112_v62 = vand.u32 2147483647, %v1087_v27 }
 0x72c   :  { %v1115_v1 = vor.u32 1.1754944e-38, %v1114_v55  ;;  %vm1113_vm5 = vcmp.eq.f32.partialorder %v1112_v62, 8.507059e+37 }
 0x730   :  { %1075 = vadd.xlane.f32.xlu2 %v1074_v31  ;;  %v1099_v31 = vand.u32 2147483648, %v1086_v44 }
 0x732   :  { %v1100_v40 = vor.u32 1.1754944e-38, %v1099_v31 }
 0x734   :  { %v1101_v33 = vsel %vm1098_vm10, %v1100_v40, %v1096_v18 }
 0x738   :  { %1006 = vadd.xlane.f32.xlu2 %v1005_v28  ;;  %v1044_v28 = vmul.f32 %v1642_v11, %v1043_v49 }
 0x73a   :  { %v1045_v2 = vadd.f32 %v1642_v11, %v1044_v28 }
 0x73f   :  { %v2328_v24 = vpop.permute.xlu0 %1348 }
 0x743   :  { %v1377_v14 = vpop.xlane.xlu2 %1376 }
 0x744   :  { %v2324_v37 = vmul.f32 %v1433_v9, %v1377_v14  ;;  %v1050_v14 = vand.u32 2147483647, %v1025_v16  ;;  %v1357_v16 = vsub.f32 %v2235_v0, %v2328_v24 }
 0x746   :  { %vm1051_vm14 = vcmp.eq.f32.partialorder %v1050_v14, 8.507059e+37  ;;  %v1437_v6 = vmul.f32 %v2324_v37, %v2247_v29  ;;  %v1453_v38 = vsel %vm195_vm2, %v2235_v0, %v1357_v16 }
 0x74b   :  { %v1071_v42 = vpop.permute.xlu2 %1070 }
 0x74c   :  { %v1077_v43 = vsel %vm195_vm2, %v1071_v42, 0.0  ;;  %v1049_v42 = vsel %vm1048_vm13, %v1642_v11, %v1045_v2  ;;  %v1456_v11 = vsel %vm937_vm3, %v1453_v38, %v2235_v0 }
 0x74d   :  { %1078 = vadd.xlane.f32.xlu1 %v1077_v43  ;;  %v1644_v43 = vpop.eup %1643  ;;  %v1054_v8 = vsel %vm1051_vm14, %v1053_v30, %v1049_v42 }
 0x74e   :  { %v1104_v52 = vmul.f32 %v1644_v43, %v1087_v27  ;;  %vm1109_vm15 = vweird.f32 %v1644_v43 }
 0x74f   :  { %vm1110_vm1 = vmor %vm1108_vm0, %vm1109_vm15 }
 0x750   :  { %v1105_v53 = vsub.f32 1.0, %v1104_v52 }
 0x752   :  { %v1374_v36 = vpop.xlane.xlu1 %1373  ;;  %v1106_v58 = vmul.f32 %v1644_v43, %v1105_v53 }
 0x753   :  { %v1419_v25 = vmul.f32 %v1418_v57, %v1374_v36 }
 0x754   :  { %v1107_v61 = vadd.f32 %v1644_v43, %v1106_v58 }
 0x755   :  { %v1436_v15 = vmul.f32 %v1419_v25, %v2242_v39 }
 0x756   :  { %v1111_v63 = vsel %vm1110_vm1, %v1644_v43, %v1107_v61 }
 0x757   :  { %v1116_v3 = vsel %vm1113_vm5, %v1115_v1, %v1111_v63 }
 0x761   :  { %v2335_v22 = vpop.permute.xlu2 %1352 }
 0x76a   :  { %v1351_v59 = vpop.permute.xlu1 %1350 }
 0x77f   :  { %v1004_v32 = vpop.xlane.xlu0 %1003 }
 0x780   :  { %v1040_v46 = vmul.f32 %v1039_v13, %v1004_v32  ;;  %v1358_v13 = vsub.f32 %v2242_v39, %v1351_v59 }
 0x782   :  { %v1056_v12 = vmul.f32 %v1040_v46, %v2267_v47  ;;  %v1454_v5 = vsel %vm195_vm2, %v2242_v39, %v1358_v13 }
 0x784   :  { %1060 = vrot.lane.b32.xlu2 %v1056_v12, %s1699_s1  ;;  %v1457_v12 = vsel %vm937_vm3, %v1454_v5, %v2242_v39 }
 0x78c   :  { %1443 = vrot.lane.b32.xlu2 %v1436_v15, %s1699_s1 }
 0x7a3   :  { %v1076_v17 = vpop.xlane.xlu2 %1075 }
 0x7a4   :  { %v1102_v34 = vmul.f32 %v1101_v33, %v1076_v17 }
 0x7a6   :  { %v1118_v9 = vmul.f32 %v1102_v34, %v2267_v47 }
 0x7a8   :  { %1122 = vrot.lane.b32.xlu0 %v1118_v9, %s1699_s1 }
 0x7ab   :  { %v1007_v45 = vpop.xlane.xlu2 %1006 }
 0x7ac   :  { %v1055_v7 = vmul.f32 %v1054_v8, %v1007_v45 }
 0x7ae   :  { %v1057_v48 = vmul.f32 %v1055_v7, %v2276_v60 }
 0x7b0   :  { %1062 = vrot.lane.b32.xlu0 %v1057_v48, %s1699_s1 }
 0x7b8   :  { %1441 = vrot.lane.b32.xlu0 %v1435_v54, %s1699_s1 }
 0x7c0   :  { %v1079_v41 = vpop.xlane.xlu1 %1078 }
 0x7c1   :  { %v1117_v4 = vmul.f32 %v1116_v3, %v1079_v41 }
 0x7c3   :  { %v1119_v50 = vmul.f32 %v1117_v4, %v2276_v60 }
 0x7c5   :  { %1124 = vrot.lane.b32.xlu1 %v1119_v50, %s1699_s1 }
 0x7cd   :  { %1445 = vrot.lane.b32.xlu1 %v1437_v6, %s1699_s1 }
 0x7de   :  { %v1061_v32 = vpop.permute.xlu2 %1060 }
 0x7df   :  { %v1066_v37 = vsub.f32 %v2267_v47, %v1061_v32 }
 0x7e1   :  { %v1130_v19 = vsel %vm195_vm2, %v2267_v47, %v1066_v37 }
 0x7e2   :  { %v1132_v25 = vsel %vm937_vm3, %v1130_v19, %v2267_v47 }
 0x7e6   :  { %v1444_v46 = vpop.permute.xlu2 %1443 }
 0x7e7   :  { %v1451_v56 = vsub.f32 %v2242_v39, %v1444_v46 }
 0x7e9   :  { %v1460_v44 = vsel %vm940_vm4, %v1457_v12, %v1451_v56 }
 0x7ea   :  { %1463 = vst [vmem:[%s2416_s8 + $0x8] sm:$0xff] %v1460_v44 }
 0x81a   :  { %v1123_v36 = vpop.permute.xlu0 %1122 }
 0x81b   :  { %v1128_v57 = vsub.f32 %v2267_v47, %v1123_v36 }
 0x81d   :  { %v1134_v15 = vsel %vm940_vm4, %v1132_v25, %v1128_v57 }
 0x81e   :  { %1136 = vst [vmem:[%s2415_s7] sm:$0xff] %v1134_v15 }
 0x822   :  { %v1063_v39 = vpop.permute.xlu0 %1062 }
 0x823   :  { %v1067_v21 = vsub.f32 %v2276_v60, %v1063_v39 }
 0x825   :  { %v1131_v24 = vsel %vm195_vm2, %v2276_v60, %v1067_v21 }
 0x826   :  { %v1133_v49 = vsel %vm937_vm3, %v1131_v24, %v2276_v60 }
 0x82a   :  { %v1442_v51 = vpop.permute.xlu0 %1441 }
 0x82b   :  { %v1450_v20 = vsub.f32 %v2235_v0, %v1442_v51  ;;  %v1359_v0 = vsub.f32 %v2247_v29, %v2335_v22 }
 0x82d   :  { %v1459_v47 = vsel %vm940_vm4, %v1456_v11, %v1450_v20  ;;  %v1455_v26 = vsel %vm195_vm2, %v2247_v29, %v1359_v0 }
 0x82e   :  { %1462 = vst [vmem:[%s2416_s8] sm:$0xff] %v1459_v47  ;;  %v1458_v28 = vsel %vm937_vm3, %v1455_v26, %v2247_v29 }
 0x837   :  { %v1125_v10 = vpop.permute.xlu1 %1124 }
 0x838   :  { %v1129_v23 = vsub.f32 %v2276_v60, %v1125_v10 }
 0x83a   :  { %v1135_v31 = vsel %vm940_vm4, %v1133_v49, %v1129_v23 }
 0x83b   :  { %1137 = vst [vmem:[%s2415_s7 + $0x8] sm:$0xff] %v1135_v31 }
 0x83f   :  { %v1446_v27 = vpop.permute.xlu1 %1445 }
 0x840   :  { %v1452_v18 = vsub.f32 %v2247_v29, %v1446_v27 }
 0x842   :  { %v1461_v60 = vsel %vm940_vm4, %v1458_v28, %v1452_v18 }
 0x843   :  { %1464 = vst [vmem:[%s2416_s8 + $0x10] sm:$0xff] %v1461_v60 }
 0x844   :  { %1693 = dma.done.wait [#allocation3], 1280  }
 0x845   :  { %1694 = vsyncadd [#allocation3], 4294966016 }
 0x846   :  { %1695 = dma.done.wait [#allocation5], 1920  }
 0x847   :  { %1696 = vsyncadd [#allocation5], 4294965376 }
 0x848   :  { %1507 = vsyncpa [#allocation3], 1 }
 0x849   :  { %1508 = vsyncpa [#allocation5], 1 }

</bundles_post_ra>
